<compile_context>
chip_gen: v7x
topology: tpu7x:2x2x1
jax: 0.10.0
libtpu: 0.0.40
codegen_flags: <defaults>
</compile_context>

<pallas_src>
import jax
import jax.numpy as jnp
from jax.experimental import pallas as pl
from jax.experimental.pallas import tpu as pltpu

_LANES = 128        # lane width every layer is padded to
_H1 = 128           # linear1 out features
_H2 = 64            # linear2 out features
_BIAS_ROWS = 8      # sublane-aligned bias segment in the packed buffer
_NEG = -1e30        # "minus infinity" bias for padded logit lanes
_MAX_TILE_B = 512   # batch-tile cap (overhead amortization)
_VMEM_DATA_BUDGET = 32 * 1024 * 1024   # bytes for blocks + resident params
_VMEM_LIMIT_CAP = 48 * 1024 * 1024     # never request more than this


def _round_up(x, m):
    return (x + m - 1) // m * m


# ---------------------------------------------------------------------------
# Kernel
# ---------------------------------------------------------------------------
def _make_kernel(k1):
    """Build the MLP kernel for a packed-parameter buffer whose w1 has k1 rows."""
    off_b1 = k1
    off_w2 = off_b1 + _BIAS_ROWS
    off_b2 = off_w2 + _LANES
    off_w3 = off_b2 + _BIAS_ROWS
    off_b3 = off_w3 + _LANES

    def kernel(x_ref, p_ref, o_ref):
        x = x_ref[...]                                   # (TILE_B, k1)

        w1 = p_ref[0:k1, :]                              # (k1, 128)
        b1 = p_ref[off_b1:off_b1 + 1, :]                 # (1, 128)
        w2 = p_ref[off_w2:off_w2 + _LANES, :]            # (128, 128) (cols>=64 zero)
        b2 = p_ref[off_b2:off_b2 + 1, :]
        w3 = p_ref[off_w3:off_w3 + _LANES, :]            # (128, 128) (rows>=64 zero)
        b3 = p_ref[off_b3:off_b3 + 1, :]                 # padded lanes hold -1e30

        wdt = w1.dtype

        # linear1 + relu (f32 accumulate on the MXU)
        h1 = jnp.dot(x, w1, preferred_element_type=jnp.float32) + b1
        h1 = jnp.maximum(h1, 0.0)
        # linear2 + relu  (padded lanes stay exactly 0)
        h2 = jnp.dot(h1.astype(wdt), w2, preferred_element_type=jnp.float32) + b2
        h2 = jnp.maximum(h2, 0.0)
        # linear3  (padded lanes get -1e30 bias -> drop out of the softmax)
        logits = jnp.dot(h2.astype(wdt), w3, preferred_element_type=jnp.float32) + b3

        # numerically stable log_softmax over the lane dim
        m = jnp.max(logits, axis=-1, keepdims=True)
        shifted = logits - m
        lse = jnp.log(jnp.sum(jnp.exp(shifted), axis=-1, keepdims=True))
        o_ref[...] = (shifted - lse).astype(o_ref.dtype)

    return kernel


# ---------------------------------------------------------------------------
# Parameter handling
# ---------------------------------------------------------------------------
def init_params(key, total_lstms, classes):
    """nn.Linear-style init; weights stored as (in, out), biases as (1, out)."""
    d_in = total_lstms * classes
    dims = [(d_in, _H1), (_H1, _H2), (_H2, classes)]
    params = []
    for fan_in, fan_out in dims:
        kw, kb, key = jax.random.split(key, 3)
        bound = 1.0 / jnp.sqrt(jnp.float32(fan_in))
        w = jax.random.uniform(kw, (fan_in, fan_out), jnp.float32, -bound, bound)
        b = jax.random.uniform(kb, (1, fan_out), jnp.float32, -bound, bound)
        params += [w, b]
    return tuple(params)


def pack_params(params, total_lstms, classes, dtype=jnp.float32):
    """Pack all weights/biases into one lane-dense (R, 128) buffer of `dtype`."""
    assert classes <= _LANES, "pack_params assumes classes <= 128"
    w1, b1, w2, b2, w3, b3 = params
    d_in = total_lstms * classes
    k1 = _round_up(d_in, _LANES)

    w1p = jnp.zeros((k1, _LANES), jnp.float32).at[:d_in, :_H1].set(w1)
    b1p = jnp.zeros((_BIAS_ROWS, _LANES), jnp.float32).at[0, :_H1].set(b1.reshape(-1))
    w2p = jnp.zeros((_LANES, _LANES), jnp.float32).at[:, :_H2].set(w2)
    b2p = jnp.zeros((_BIAS_ROWS, _LANES), jnp.float32).at[0, :_H2].set(b2.reshape(-1))
    w3p = jnp.zeros((_LANES, _LANES), jnp.float32).at[:_H2, :classes].set(w3)
    b3p = jnp.zeros((_BIAS_ROWS, _LANES), jnp.float32)
    b3p = b3p.at[0, :].set(_NEG)                    # padded logit lanes -> -inf-ish
    b3p = b3p.at[0, :classes].set(b3.reshape(-1))

    packed = jnp.concatenate([w1p, b1p, w2p, b2p, w3p, b3p], axis=0)
    return packed.astype(dtype)


# ---------------------------------------------------------------------------
# Tile selection (overhead amortization + VMEM gating)
# ---------------------------------------------------------------------------
def _pick_tile_b(b, k1, in_bytes, out_bytes, packed_bytes):
    # Double-buffered x + out blocks per row of batch tile.
    per_row = 2 * (k1 * in_bytes + _LANES * out_bytes)
    avail = max(_VMEM_DATA_BUDGET - packed_bytes, 8 * per_row)
    vmem_rows = max(8, (avail // per_row) // 8 * 8)

    tile = min(_MAX_TILE_B, vmem_rows)
    if b > 8:
        # Keep at least 2 grid steps so both v7x TensorCores get work.
        tile = min(tile, _round_up((b + 1) // 2, 8))
    return max(8, tile)


# ---------------------------------------------------------------------------
# Forward passes
# ---------------------------------------------------------------------------
def ense_lstm_forward_batched(x_batch, packed, classes, out_dtype=jnp.float32):
    """Apply the enseLSTM head independently to each sample in a batch.

    x_batch: (B, ...) with prod(...) == total_lstms * classes.  Returns
    (B, classes) log-probabilities (equivalent to vmapping the module forward).
    """
    b = x_batch.shape[0]
    in_dtype = packed.dtype
    x2 = x_batch.reshape(b, -1).astype(in_dtype)
    d_in = x2.shape[1]
    k1 = _round_up(d_in, _LANES)
    packed_rows = k1 + 2 * _LANES + 3 * _BIAS_ROWS
    assert packed.shape == (packed_rows, _LANES)

    # zero-pad features to a lane-dense width
    if d_in != k1:
        x2 = jnp.pad(x2, ((0, 0), (0, k1 - d_in)))

    in_bytes = jnp.dtype(in_dtype).itemsize
    out_bytes = jnp.dtype(out_dtype).itemsize
    packed_bytes = packed_rows * _LANES * in_bytes

    tile_b = _pick_tile_b(b, k1, in_bytes, out_bytes, packed_bytes)
    b_pad = _round_up(b, tile_b)
    if b_pad != b:
        x2 = jnp.pad(x2, ((0, b_pad - b), (0, 0)))
    grid = (b_pad // tile_b,)

    needed = packed_bytes + 2 * tile_b * (k1 * in_bytes + _LANES * out_bytes)
    vmem_limit = int(min(_VMEM_LIMIT_CAP, max(needed + 8 * 1024 * 1024,
                                              32 * 1024 * 1024)))

    cost = pl.CostEstimate(
        flops=2 * b_pad * (k1 * _LANES + _LANES * _LANES + _LANES * _LANES),
        transcendentals=b_pad * (_LANES + 1),
        bytes_accessed=(b_pad * k1 * in_bytes + packed_bytes
                        + b_pad * _LANES * out_bytes),
    )

    out = pl.pallas_call(
        _make_kernel(k1),
        out_shape=jax.ShapeDtypeStruct((b_pad, _LANES), out_dtype),
        grid=grid,
        in_specs=[
            # x tile: streamed, default double-buffered
            pl.BlockSpec((tile_b, k1), lambda i: (i, 0)),
            # packed params: constant block index -> resident; single-buffered
            pl.BlockSpec((packed_rows, _LANES), lambda i: (0, 0),
                         pipeline_mode=pl.Buffered(1)),
        ],
        out_specs=pl.BlockSpec((tile_b, _LANES), lambda i: (i, 0)),
        compiler_params=pltpu.CompilerParams(
            dimension_semantics=("parallel",),
            vmem_limit_bytes=vmem_limit,
        ),
        cost_estimate=cost,
    )(x2, packed)

    # NOTE: a fused consumer could read the padded (b_pad, 128) buffer directly
    # and skip this extra HBM pass; we slice here to match module semantics.
    return out[:b, :classes]


def ense_lstm_forward(input_data, packed, classes, out_dtype=jnp.float32):
    """Exact module semantics: view(1, -1) -> MLP -> log_softmax, (1, classes)."""
    return ense_lstm_forward_batched(input_data.reshape(1, -1), packed, classes,
                                     out_dtype=out_dtype)


# ---------------------------------------------------------------------------
# Pure-JAX references
# ---------------------------------------------------------------------------
def reference_forward_batched(x_batch, params):
    w1, b1, w2, b2, w3, b3 = params
    x = x_batch.reshape(x_batch.shape[0], -1).astype(jnp.float32)
    h1 = jnp.maximum(x @ w1 + b1, 0.0)
    h2 = jnp.maximum(h1 @ w2 + b2, 0.0)
    return jax.nn.log_softmax(h2 @ w3 + b3, axis=-1)


def reference_forward(input_data, params):
    return reference_forward_batched(input_data.reshape(1, -1), params)


# ---------------------------------------------------------------------------
if __name__ == "__main__":
    total_lstms, classes = 4, 8

    key = jax.random.PRNGKey(0)
    k_single, k_batch, k_params = jax.random.split(key, 3)

    params = init_params(k_params, total_lstms, classes)
    packed_f32 = pack_params(params, total_lstms, classes, dtype=jnp.float32)
    packed_bf16 = pack_params(params, total_lstms, classes, dtype=jnp.bfloat16)

    # 1) Original module semantics: single (total_lstms, classes) input, f32 path.
    single = jax.random.normal(k_single, (total_lstms, classes), jnp.float32)
    out1 = ense_lstm_forward(single, packed_f32, classes)
    jax.block_until_ready(out1)
    ref1 = reference_forward(single, params)
    assert out1.shape == (1, classes)
    assert jnp.allclose(out1, ref1, atol=1e-4, rtol=1e-4), "single-sample mismatch"

    # 2) Batched f32 path (tight parity with the reference).
    B = 256
    xb = jax.random.normal(k_batch, (B, total_lstms, classes), jnp.float32)
    outB = ense_lstm_forward_batched(xb, packed_f32, classes)
    jax.block_until_ready(outB)
    refB = reference_forward_batched(xb, params)
    assert outB.shape == (B, classes)
    assert jnp.allclose(outB, refB, atol=1e-4, rtol=1e-4), "batched f32 mismatch"

    # 3) Batched bf16 streaming path (perf path): bf16 x + weights, f32 accumulate.
    outB_bf16 = ense_lstm_forward_batched(xb, packed_bf16, classes)
    jax.block_until_ready(outB_bf16)
    assert outB_bf16.shape == (B, classes)
    assert jnp.allclose(outB_bf16, refB, atol=1e-1, rtol=1e-1), "batched bf16 mismatch"

    print("KERNEL_OK")
</pallas_src>

<mosaic_0001>
module attributes {stable_mosaic.version = 11 : i64} {
  func.func @kernel(%arg0: i32, %arg1: memref<512x128xf32, #tpu.memory_space<vmem>>, %arg2: memref<408x128xf32, #tpu.memory_space<vmem>>, %arg3: memref<512x128xf32, #tpu.memory_space<vmem>>) attributes {dimension_semantics = [#tpu.dimension_semantics<parallel>], iteration_bounds = array<i64: 1>, scalar_prefetch = 0 : i64, scratch_operands = 0 : i64, tpu.core_type = #tpu.core_type<tc>, window_params = [{transform_indices = @transform_0, window_bounds = array<i64: 512, 128>}, {pipeline_mode = #tpu.pipeline_mode<synchronous>, transform_indices = @transform_1, window_bounds = array<i64: 408, 128>}, {transform_indices = @transform_2, window_bounds = array<i64: 512, 128>}]} {
    %c0 = arith.constant 0 : index
    %c0_0 = arith.constant 0 : index
    %0 = vector.load %arg1[%c0, %c0_0] : memref<512x128xf32, #tpu.memory_space<vmem>>, vector<512x128xf32>
    %c0_1 = arith.constant 0 : index
    %c0_2 = arith.constant 0 : index
    %1 = vector.load %arg2[%c0_1, %c0_2] : memref<408x128xf32, #tpu.memory_space<vmem>>, vector<128x128xf32>
    %c128 = arith.constant 128 : index
    %c0_3 = arith.constant 0 : index
    %2 = vector.load %arg2[%c128, %c0_3] : memref<408x128xf32, #tpu.memory_space<vmem>>, vector<1x128xf32>
    %c136 = arith.constant 136 : index
    %c0_4 = arith.constant 0 : index
    %3 = vector.load %arg2[%c136, %c0_4] : memref<408x128xf32, #tpu.memory_space<vmem>>, vector<128x128xf32>
    %c264 = arith.constant 264 : index
    %c0_5 = arith.constant 0 : index
    %4 = vector.load %arg2[%c264, %c0_5] : memref<408x128xf32, #tpu.memory_space<vmem>>, vector<1x128xf32>
    %c272 = arith.constant 272 : index
    %c0_6 = arith.constant 0 : index
    %5 = vector.load %arg2[%c272, %c0_6] : memref<408x128xf32, #tpu.memory_space<vmem>>, vector<128x128xf32>
    %c400 = arith.constant 400 : index
    %c0_7 = arith.constant 0 : index
    %6 = vector.load %arg2[%c400, %c0_7] : memref<408x128xf32, #tpu.memory_space<vmem>>, vector<1x128xf32>
    %cst = arith.constant dense<0.000000e+00> : vector<512x128xf32>
    %7 = tpu.matmul %0, %1, %cst {dimension_numbers = #tpu.dot_dimension_numbers<[1], [0], [0], [1], [0, 0, 1, 1], [], []>} : vector<512x128xf32>, vector<128x128xf32>, vector<512x128xf32> -> vector<512x128xf32>
    %8 = vector.broadcast %2 : vector<1x128xf32> to vector<512x128xf32>
    %9 = arith.addf %7, %8 : vector<512x128xf32>
    %cst_8 = arith.constant 0.000000e+00 : f32
    %10 = vector.broadcast %cst_8 : f32 to vector<512x128xf32>
    %11 = arith.maximumf %9, %10 : vector<512x128xf32>
    %cst_9 = arith.constant dense<0.000000e+00> : vector<512x128xf32>
    %12 = tpu.matmul %11, %3, %cst_9 {dimension_numbers = #tpu.dot_dimension_numbers<[1], [0], [0], [1], [0, 0, 1, 1], [], []>} : vector<512x128xf32>, vector<128x128xf32>, vector<512x128xf32> -> vector<512x128xf32>
    %13 = vector.broadcast %4 : vector<1x128xf32> to vector<512x128xf32>
    %14 = arith.addf %12, %13 : vector<512x128xf32>
    %cst_10 = arith.constant 0.000000e+00 : f32
    %15 = vector.broadcast %cst_10 : f32 to vector<512x128xf32>
    %16 = arith.maximumf %14, %15 : vector<512x128xf32>
    %cst_11 = arith.constant dense<0.000000e+00> : vector<512x128xf32>
    %17 = tpu.matmul %16, %5, %cst_11 {dimension_numbers = #tpu.dot_dimension_numbers<[1], [0], [0], [1], [0, 0, 1, 1], [], []>} : vector<512x128xf32>, vector<128x128xf32>, vector<512x128xf32> -> vector<512x128xf32>
    %18 = vector.broadcast %6 : vector<1x128xf32> to vector<512x128xf32>
    %19 = arith.addf %17, %18 : vector<512x128xf32>
    %cst_12 = arith.constant dense<0xFF800000> : vector<512xf32>
    %20 = vector.multi_reduction <maximumf>, %19, %cst_12 [1] : vector<512x128xf32> to vector<512xf32>
    %21 = vector.shape_cast %20 : vector<512xf32> to vector<512x1xf32>
    %22 = vector.broadcast %21 : vector<512x1xf32> to vector<512x128xf32>
    %23 = arith.subf %19, %22 : vector<512x128xf32>
    %24 = math.exp %23 : vector<512x128xf32>
    %cst_13 = arith.constant dense<0.000000e+00> : vector<512xf32>
    %25 = vector.multi_reduction <add>, %24, %cst_13 [1] : vector<512x128xf32> to vector<512xf32>
    %26 = vector.shape_cast %25 : vector<512xf32> to vector<512x1xf32>
    %27 = math.log %26 : vector<512x1xf32>
    %28 = vector.broadcast %27 : vector<512x1xf32> to vector<512x128xf32>
    %29 = arith.subf %23, %28 : vector<512x128xf32>
    %c0_14 = arith.constant 0 : index
    %c0_15 = arith.constant 0 : index
    %30 = vector.load %arg3[%c0_14, %c0_15] : memref<512x128xf32, #tpu.memory_space<vmem>>, vector<512x128xf32>
    tpu.vector_store %arg3[%c0_14, %c0_15], %29 {strides = array<i32>} : memref<512x128xf32, #tpu.memory_space<vmem>>, vector<512x128xf32>,
    return
  }
  func.func @transform_0(%arg0: i32) -> (i32, i32) {
    %c0_i32 = arith.constant 0 : i32
    %c0_i32_0 = arith.constant 0 : i32
    return %arg0, %c0_i32 : i32, i32
  }
  func.func @transform_1(%arg0: i32) -> (i32, i32) {
    %c0_i32 = arith.constant 0 : i32
    %c0_i32_0 = arith.constant 0 : i32
    %c0_i32_1 = arith.constant 0 : i32
    return %c0_i32, %c0_i32_0 : i32, i32
  }
  func.func @transform_2(%arg0: i32) -> (i32, i32) {
    %c0_i32 = arith.constant 0 : i32
    %c0_i32_0 = arith.constant 0 : i32
    return %arg0, %c0_i32 : i32, i32
  }
}

</mosaic_0001>

<bundles_post_ra>
// kernel: tpu_custom_call.1
= control target key start
LH: loop header
LB: loop body
LE: loop exit
PB: predicated region body
PF: predicated region fallthrough
CT: control target
= control target key end

     0   :  { %7 = vsyncpa [#allocation3], 0  ;;  %s4115_s0 = inlined_call_operand.hbm [shape: f32[512,128], index: 0, kind: input, shape index: {}]   ;;  %s4116_s1 = inlined_call_operand.hbm [shape: f32[408,128], index: 1, kind: input, shape index: {}]   ;;  %s4117_s2 = inlined_call_operand.hbm [shape: f32[512,128], index: 2, kind: output, shape index: {}]  }
   0x1   :  { %8 = vsyncpa [#allocation6], 0 }
   0x2   :  { %9 = vsyncpa [#allocation4], 0  ;;  %s3244_s9 = smov [#allocation2]   ;;  %s3172_s13 = scalar_lea.hbm %s4115_s0, 8192 }
   0x3   :  { %s15_s10 = sshll.u32 %s3244_s9, 4  ;;  %p3173_p0 = scmp.ne.s32.totalorder %s4115_s0, %s3172_s13  ;;  %s16_s10 = int_to_ptr.vmem [resolvable:$true] %s15_s10 }
   0x4   :  { %p3176_p1 = scmp.lt.u32.totalorder %s3172_s13, %s4115_s0 }
   0x6   :  { %p3178_p2 = pnand %p3176_p1, %p3173_p0 }
   0x8   :  { %3181 = shalt.err (!%p3178_p2)
}
   0x9   :  { %s3182_s18 = scalar_lea.vmem %s16_s10, 8192  ;;  %p3187_p4 = scmp.lt.s32.totalorder %s16_s10, %s16_s10 }
   0xa   :  { %p3183_p3 = scmp.ne.s32.totalorder %s16_s10, %s3182_s18  ;;  %p3188_p5 = scmp.lt.s32.totalorder %s3182_s18, %s3182_s18 }
   0xc   :  { %p3189_p6 = por %p3188_p5, %p3187_p4 }
   0xe   :  { %p3190_p7 = pnand %p3189_p6, %p3183_p3 }
  0x10   :  { %3193 = shalt.err (!%p3190_p7)
}
  0x11   :  { %s3245_s19 = smov 128   ;;  %s3246_s20 = smov 8  }
  0x12   :  { %21 = dma.hbm_to_vmem [thread:$0]  %s4115_s0, 8192, %s16_s10, [#allocation3], %s3245_s19, %s3245_s19, %s3246_s20  }
  0x13   :  { %s3247_s23 = smov [#allocation5]   ;;  %s3194_s27 = scalar_lea.hbm %s4116_s1, 6528 }
  0x14   :  { %s27_s24 = sshll.u32 %s3247_s23, 4  ;;  %p3195_p8 = scmp.ne.s32.totalorder %s4116_s1, %s3194_s27  ;;  %s28_s24 = int_to_ptr.vmem [resolvable:$true] %s27_s24 }
  0x15   :  { %p3198_p9 = scmp.lt.u32.totalorder %s3194_s27, %s4116_s1 }
  0x17   :  { %p3200_p10 = pnand %p3198_p9, %p3195_p8 }
  0x19   :  { %3203 = shalt.err (!%p3200_p10)
}
  0x1a   :  { %s3204_s4 = scalar_lea.vmem %s28_s24, 6528  ;;  %p3209_p12 = scmp.lt.s32.totalorder %s28_s24, %s28_s24 }
  0x1b   :  { %p3205_p11 = scmp.ne.s32.totalorder %s28_s24, %s3204_s4  ;;  %p3210_p13 = scmp.lt.s32.totalorder %s3204_s4, %s3204_s4 }
  0x1d   :  { %p3211_p0 = por %p3210_p13, %p3209_p12 }
  0x1f   :  { %p3212_p1 = pnand %p3211_p0, %p3205_p11 }
  0x21   :  { %3215 = shalt.err (!%p3212_p1)
}
  0x22   :  { %33 = dma.hbm_to_vmem [thread:$0]  %s4116_s1, 6528, %s28_s24, [#allocation6], %s3245_s19, %s3245_s19, %s3246_s20  }
  0x23   :  { %3238 = dma.done.wait [#allocation3], 8192  }
  0x24   :  { %3239 = vsyncadd [#allocation3], 4294959104 }
  0x25   :  { %3240 = dma.done.wait [#allocation6], 6528  }
  0x26   :  { %3241 = vsyncadd [#allocation6], 4294960768  ;;  %v104_v0 = vld [vmem:[#allocation5] sm:$0xff]  ;;  %v105_v1 = vld [vmem:[#allocation5 + $0x8] sm:$0xff]  ;;  %s3248_s1 = smov [#allocation7]  }
  0x27   :  { %v106_v2 = vld [vmem:[#allocation5 + $0x10] sm:$0xff]  ;;  %v2799_v3 = vpack.c.bf16 %v105_v1, %v104_v0  ;;  %v107_v4 = vld [vmem:[#allocation5 + $0x18] sm:$0xff]  ;;  %v108_v6 = vld [vmem:[#allocation5 + $0x20] sm:$0xff]  ;;  %s2159_s6 = sshll.u32 %s3248_s1, 4  ;;  %s2160_s6 = int_to_ptr.vmem [resolvable:$true] %s2159_s6 }
  0x28   :  { %v2803_v5 = vpack.c.bf16 %v107_v4, %v106_v2  ;;  %v109_v7 = vld [vmem:[#allocation5 + $0x28] sm:$0xff]  ;;  %v40_v9 = vld [vmem:[#allocation2] sm:$0xff]  ;;  %v110_v10 = vld [vmem:[#allocation5 + $0x30] sm:$0xff]  ;;  %s3216_s7 = scalar_lea.vmem %s2160_s6, 8192  ;;  %p3221_p3 = scmp.lt.s32.totalorder %s2160_s6, %s2160_s6 }
  0x29   :  { %2800 = vmatprep.subr.bf16.mxu0 %v2799_v3  ;;  %2895 = vmatprep.subr.bf16.mxu1 %v2799_v3  ;;  %v2807_v8 = vpack.c.bf16 %v109_v7, %v108_v6  ;;  %v111_v11 = vld [vmem:[#allocation5 + $0x38] sm:$0xff]  ;;  %v112_v13 = vld [vmem:[#allocation5 + $0x40] sm:$0xff]  ;;  %v113_v14 = vld [vmem:[#allocation5 + $0x48] sm:$0xff]  ;;  %p3217_p2 = scmp.ne.s32.totalorder %s2160_s6, %s3216_s7  ;;  %p3222_p4 = scmp.lt.s32.totalorder %s3216_s7, %s3216_s7 }
  0x2a   :  { %2802 = vmatpush3.bf16.msra.mxu0 %v2799_v3  ;;  %2903 = vmatpush3.bf16.msra.mxu1 %v2799_v3  ;;  %v2811_v12 = vpack.c.bf16 %v111_v11, %v110_v10  ;;  %v2815_v15 = vpack.c.bf16 %v113_v14, %v112_v13  ;;  %v114_v16 = vld [vmem:[#allocation5 + $0x50] sm:$0xff]  ;;  %v115_v17 = vld [vmem:[#allocation5 + $0x58] sm:$0xff]  ;;  %v72_v18 = vld [vmem:[#allocation2 + $0x100] sm:$0xff] }
  0x2b   :  { %2804 = vmatprep.subr.bf16.mxu0 %v2803_v5  ;;  %2896 = vmatprep.subr.bf16.mxu1 %v2803_v5  ;;  %v2819_v19 = vpack.c.bf16 %v115_v17, %v114_v16  ;;  %v116_v20 = vld [vmem:[#allocation5 + $0x60] sm:$0xff]  ;;  %v117_v21 = vld [vmem:[#allocation5 + $0x68] sm:$0xff]  ;;  %v118_v23 = vld [vmem:[#allocation5 + $0x70] sm:$0xff]  ;;  %p3223_p5 = por %p3222_p4, %p3221_p3 }
  0x2c   :  { %2447 = vmatprep.mubr.f32.mxu0 %v40_v9  ;;  %2495 = vmatprep.mubr.f32.mxu1 %v72_v18  ;;  %v2823_v22 = vpack.c.bf16 %v117_v21, %v116_v20  ;;  %v119_v24 = vld [vmem:[#allocation5 + $0x78] sm:$0xff]  ;;  %v121_v26 = vld [vmem:[#allocation5 + $0x88] sm:$0xff]  ;;  %v122_v27 = vld [vmem:[#allocation5 + $0x90] sm:$0xff] }
  0x2d   :  { %v2827_v25 = vpack.c.bf16 %v119_v24, %v118_v23  ;;  %v2831_v28 = vpack.c.bf16 %v122_v27, %v121_v26  ;;  %v123_v29 = vld [vmem:[#allocation5 + $0x98] sm:$0xff]  ;;  %v124_v30 = vld [vmem:[#allocation5 + $0xa0] sm:$0xff]  ;;  %v41_v31 = vld [vmem:[#allocation2 + $0x8] sm:$0xff]  ;;  %p3224_p6 = pnand %p3223_p5, %p3217_p2 }
  0x2e   :  { %2806 = vmatpush3.bf16.msra.mxu0 %v2803_v5  ;;  %2904 = vmatpush3.bf16.msra.mxu1 %v2803_v5  ;;  %v73_v32 = vld [vmem:[#allocation2 + $0x108] sm:$0xff]  ;;  %v42_v33 = vld [vmem:[#allocation2 + $0x10] sm:$0xff]  ;;  %v2835_v35 = vpack.c.bf16 %v124_v30, %v123_v29  ;;  %v43_v38 = vld [vmem:[#allocation2 + $0x18] sm:$0xff] }
  0x2f   :  { %2808 = vmatprep.subr.bf16.mxu0 %v2807_v8  ;;  %2897 = vmatprep.subr.bf16.mxu1 %v2807_v8  ;;  %v74_v34 = vld [vmem:[#allocation2 + $0x110] sm:$0xff]  ;;  %v125_v36 = vld [vmem:[#allocation5 + $0xa8] sm:$0xff]  ;;  %v75_v39 = vld [vmem:[#allocation2 + $0x118] sm:$0xff] }
  0x30   :  { %v126_v37 = vld [vmem:[#allocation5 + $0xb0] sm:$0xff]  ;;  %v44_v40 = vld [vmem:[#allocation2 + $0x20] sm:$0xff]  ;;  %v127_v43 = vld [vmem:[#allocation5 + $0xb8] sm:$0xff] }
  0x31   :  { %v76_v41 = vld [vmem:[#allocation2 + $0x120] sm:$0xff]  ;;  %v2839_v42 = vpack.c.bf16 %v126_v37, %v125_v36  ;;  %v45_v45 = vld [vmem:[#allocation2 + $0x28] sm:$0xff]  ;;  %v46_v47 = vld [vmem:[#allocation2 + $0x30] sm:$0xff] }
  0x32   :  { %2810 = vmatpush3.bf16.msra.mxu0 %v2807_v8  ;;  %2905 = vmatpush3.bf16.msra.mxu1 %v2807_v8  ;;  %v128_v44 = vld [vmem:[#allocation5 + $0xc0] sm:$0xff]  ;;  %v77_v46 = vld [vmem:[#allocation2 + $0x128] sm:$0xff]  ;;  %v78_v48 = vld [vmem:[#allocation2 + $0x130] sm:$0xff] }
  0x33   :  { %2812 = vmatprep.subr.bf16.mxu0 %v2811_v12  ;;  %2898 = vmatprep.subr.bf16.mxu1 %v2811_v12  ;;  %v2843_v49 = vpack.c.bf16 %v128_v44, %v127_v43  ;;  %v129_v50 = vld [vmem:[#allocation5 + $0xc8] sm:$0xff]  ;;  %v130_v51 = vld [vmem:[#allocation5 + $0xd0] sm:$0xff]  ;;  %v47_v52 = vld [vmem:[#allocation2 + $0x38] sm:$0xff] }
  0x34   :  { %v79_v53 = vld [vmem:[#allocation2 + $0x138] sm:$0xff]  ;;  %v48_v54 = vld [vmem:[#allocation2 + $0x40] sm:$0xff]  ;;  %v2847_v56 = vpack.c.bf16 %v130_v51, %v129_v50  ;;  %v49_v59 = vld [vmem:[#allocation2 + $0x48] sm:$0xff] }
  0x35   :  { %v80_v55 = vld [vmem:[#allocation2 + $0x140] sm:$0xff]  ;;  %v131_v57 = vld [vmem:[#allocation5 + $0xd8] sm:$0xff]  ;;  %v81_v60 = vld [vmem:[#allocation2 + $0x148] sm:$0xff] }
  0x36   :  { %2814 = vmatpush3.bf16.msra.mxu0 %v2811_v12  ;;  %2906 = vmatpush3.bf16.msra.mxu1 %v2811_v12  ;;  %v132_v58 = vld [vmem:[#allocation5 + $0xe0] sm:$0xff]  ;;  %v50_v61 = vld [vmem:[#allocation2 + $0x50] sm:$0xff]  ;;  %v133_v0 = vld [vmem:[#allocation5 + $0xe8] sm:$0xff] }
  0x37   :  { %2816 = vmatprep.subr.bf16.mxu0 %v2815_v15  ;;  %2899 = vmatprep.subr.bf16.mxu1 %v2815_v15  ;;  %v82_v62 = vld [vmem:[#allocation2 + $0x150] sm:$0xff]  ;;  %v2851_v63 = vpack.c.bf16 %v132_v58, %v131_v57  ;;  %v51_v2 = vld [vmem:[#allocation2 + $0x58] sm:$0xff]  ;;  %v52_v4 = vld [vmem:[#allocation2 + $0x60] sm:$0xff] }
  0x38   :  { %v134_v1 = vld [vmem:[#allocation5 + $0xf0] sm:$0xff]  ;;  %v83_v3 = vld [vmem:[#allocation2 + $0x158] sm:$0xff]  ;;  %v84_v5 = vld [vmem:[#allocation2 + $0x160] sm:$0xff] }
  0x39   :  { %v2855_v6 = vpack.c.bf16 %v134_v1, %v133_v0  ;;  %v135_v7 = vld [vmem:[#allocation5 + $0xf8] sm:$0xff]  ;;  %v136_v8 = vld [vmem:[#allocation5 + $0x100] sm:$0xff]  ;;  %v53_v9 = vld [vmem:[#allocation2 + $0x68] sm:$0xff] }
  0x3a   :  { %2818 = vmatpush3.bf16.msra.mxu0 %v2815_v15  ;;  %2907 = vmatpush3.bf16.msra.mxu1 %v2815_v15  ;;  %v85_v10 = vld [vmem:[#allocation2 + $0x168] sm:$0xff]  ;;  %v54_v11 = vld [vmem:[#allocation2 + $0x70] sm:$0xff]  ;;  %v2859_v13 = vpack.c.bf16 %v136_v8, %v135_v7  ;;  %v55_v14 = vld [vmem:[#allocation2 + $0x78] sm:$0xff] }
  0x3b   :  { %2820 = vmatprep.subr.bf16.mxu0 %v2819_v19  ;;  %2900 = vmatprep.subr.bf16.mxu1 %v2819_v19  ;;  %v86_v12 = vld [vmem:[#allocation2 + $0x170] sm:$0xff]  ;;  %v87_v15 = vld [vmem:[#allocation2 + $0x178] sm:$0xff]  ;;  %v56_v16 = vld [vmem:[#allocation2 + $0x80] sm:$0xff] }
  0x3c   :  { %v88_v17 = vld [vmem:[#allocation2 + $0x180] sm:$0xff]  ;;  %v57_v18 = vld [vmem:[#allocation2 + $0x88] sm:$0xff]  ;;  %v58_v20 = vld [vmem:[#allocation2 + $0x90] sm:$0xff] }
  0x3d   :  { %v90_v21 = vld [vmem:[#allocation2 + $0x190] sm:$0xff]  ;;  %v91_v23 = vld [vmem:[#allocation2 + $0x198] sm:$0xff]  ;;  %v60_v24 = vld [vmem:[#allocation2 + $0xa0] sm:$0xff] }
  0x3e   :  { %2822 = vmatpush3.bf16.msra.mxu0 %v2819_v19  ;;  %2908 = vmatpush3.bf16.msra.mxu1 %v2819_v19  ;;  %v89_v19 = vld [vmem:[#allocation2 + $0x188] sm:$0xff]  ;;  %v94_v29 = vld [vmem:[#allocation2 + $0x1b0] sm:$0xff]  ;;  %v63_v30 = vld [vmem:[#allocation2 + $0xb8] sm:$0xff] }
  0x3f   :  { %2824 = vmatprep.subr.bf16.mxu0 %v2823_v22  ;;  %2901 = vmatprep.subr.bf16.mxu1 %v2823_v22  ;;  %v61_v26 = vld [vmem:[#allocation2 + $0xa8] sm:$0xff]  ;;  %v66_v36 = vld [vmem:[#allocation2 + $0xd0] sm:$0xff]  ;;  %v139_v57 = vld [vmem:[#allocation5 + $0x118] sm:$0xff] }
  0x40   :  { %v93_v27 = vld [vmem:[#allocation2 + $0x1a8] sm:$0xff]  ;;  %v98_v37 = vld [vmem:[#allocation2 + $0x1d0] sm:$0xff]  ;;  %v140_v58 = vld [vmem:[#allocation5 + $0x120] sm:$0xff] }
  0x41   :  { %v101_v43 = vld [vmem:[#allocation2 + $0x1e8] sm:$0xff]  ;;  %v70_v44 = vld [vmem:[#allocation2 + $0xf0] sm:$0xff]  ;;  %v143_v7 = vld [vmem:[#allocation5 + $0x138] sm:$0xff] }
  0x42   :  { %2826 = vmatpush3.bf16.msra.mxu0 %v2823_v22  ;;  %2909 = vmatpush3.bf16.msra.mxu1 %v2823_v22  ;;  %v59_v22 = vld [vmem:[#allocation2 + $0x98] sm:$0xff] }
  0x43   :  { %2828 = vmatprep.subr.bf16.mxu0 %v2827_v25  ;;  %2902 = vmatprep.subr.bf16.mxu1 %v2827_v25 }
  0x46   :  { %2830 = vmatpush3.bf16.msra.mxu0 %v2827_v25  ;;  %2910 = vmatpush3.bf16.msra.mxu1 %v2827_v25  ;;  %v92_v25 = vld [vmem:[#allocation2 + $0x1a0] sm:$0xff] }
  0x47   :  { %2832 = vmatprep.subr.bf16.mxu1 %v2831_v28 }
  0x49   :  { %2448 = vmatmul.mubr.f32.vlgmr.msra.gmra.mrb[0].mxu0 %v41_v31  ;;  %2496 = vmatmul.mubr.f32.vlgmr.msra.gmra.mrb[0].mxu1 %v73_v32  ;;  %v95_v31 = vld [vmem:[#allocation2 + $0x1b8] sm:$0xff]  ;;  %v64_v32 = vld [vmem:[#allocation2 + $0xc0] sm:$0xff] }
  0x4a   :  { %2450 = vmatprep.mubr.f32.mxu0 %v42_v33  ;;  %2498 = vmatprep.mubr.f32.mxu1 %v74_v34  ;;  %v96_v33 = vld [vmem:[#allocation2 + $0x1c0] sm:$0xff]  ;;  %v65_v34 = vld [vmem:[#allocation2 + $0xc8] sm:$0xff] }
  0x4b   :  { %2834 = vmatpush3.bf16.msra.mxu1 %v2831_v28  ;;  %v62_v28 = vld [vmem:[#allocation2 + $0xb0] sm:$0xff] }
  0x4c   :  { %2836 = vmatprep.subr.bf16.mxu1 %v2835_v35 }
  0x4d   :  { %2451 = vmatmul.mubr.f32.gmra.mrb[2].mxu0 %v43_v38  ;;  %2499 = vmatmul.mubr.f32.gmra.mrb[2].mxu1 %v75_v39  ;;  %v67_v38 = vld [vmem:[#allocation2 + $0xd8] sm:$0xff] }
  0x4e   :  { %2453 = vmatprep.mubr.f32.mxu0 %v44_v40  ;;  %2501 = vmatprep.mubr.f32.mxu1 %v76_v41  ;;  %v99_v39 = vld [vmem:[#allocation2 + $0x1d8] sm:$0xff]  ;;  %v68_v40 = vld [vmem:[#allocation2 + $0xe0] sm:$0xff] }
  0x4f   :  { %2838 = vmatpush3.bf16.msra.mxu1 %v2835_v35  ;;  %v97_v35 = vld [vmem:[#allocation2 + $0x1c8] sm:$0xff]  ;;  %v100_v41 = vld [vmem:[#allocation2 + $0x1e0] sm:$0xff] }
  0x50   :  { %2840 = vmatprep.subr.bf16.mxu1 %v2839_v42 }
  0x51   :  { %2454 = vmatmul.mubr.f32.gmra.mrb[4].mxu0 %v45_v45  ;;  %2502 = vmatmul.mubr.f32.gmra.mrb[4].mxu1 %v77_v46  ;;  %v102_v45 = vld [vmem:[#allocation2 + $0x1f0] sm:$0xff]  ;;  %v71_v46 = vld [vmem:[#allocation2 + $0xf8] sm:$0xff] }
  0x52   :  { %2456 = vmatprep.mubr.f32.mxu0 %v46_v47  ;;  %2504 = vmatprep.mubr.f32.mxu1 %v78_v48  ;;  %v103_v47 = vld [vmem:[#allocation2 + $0x1f8] sm:$0xff]  ;;  %v3294_v48 = vld [vmem:[#allocation5 + $0x80] ss:$0 sm:$0xff] }
  0x53   :  { %2842 = vmatpush3.bf16.msra.mxu1 %v2839_v42  ;;  %v69_v42 = vld [vmem:[#allocation2 + $0xe8] sm:$0xff] }
  0x54   :  { %2844 = vmatprep.subr.bf16.mxu1 %v2843_v49 }
  0x55   :  { %2457 = vmatmul.mubr.f32.gmra.mrb[6].mxu0 %v47_v52  ;;  %2505 = vmatmul.mubr.f32.gmra.mrb[6].mxu1 %v79_v53 }
  0x56   :  { %2459 = vmatprep.mubr.f32.mxu0 %v48_v54  ;;  %2507 = vmatprep.mubr.f32.mxu1 %v80_v55 }
  0x57   :  { %2846 = vmatpush3.bf16.msra.mxu1 %v2843_v49 }
  0x58   :  { %2848 = vmatprep.subr.bf16.mxu1 %v2847_v56 }
  0x59   :  { %2460 = vmatmul.mubr.f32.gmra.mrb[8].mxu0 %v49_v59  ;;  %2508 = vmatmul.mubr.f32.gmra.mrb[8].mxu1 %v81_v60 }
  0x5a   :  { %2462 = vmatprep.mubr.f32.mxu0 %v50_v61  ;;  %2510 = vmatprep.mubr.f32.mxu1 %v82_v62 }
  0x5b   :  { %2850 = vmatpush3.bf16.msra.mxu1 %v2847_v56  ;;  %v138_v56 = vld [vmem:[#allocation5 + $0x110] sm:$0xff] }
  0x5c   :  { %2852 = vmatprep.subr.bf16.mxu1 %v2851_v63  ;;  %v2863_v62 = vpack.c.bf16 %v139_v57, %v138_v56 }
  0x5d   :  { %2463 = vmatmul.mubr.f32.gmra.mrb[10].mxu0 %v51_v2  ;;  %2511 = vmatmul.mubr.f32.gmra.mrb[10].mxu1 %v83_v3 }
  0x5e   :  { %2465 = vmatprep.mubr.f32.mxu0 %v52_v4  ;;  %2513 = vmatprep.mubr.f32.mxu1 %v84_v5 }
  0x5f   :  { %2854 = vmatpush3.bf16.msra.mxu1 %v2851_v63  ;;  %v141_v63 = vld [vmem:[#allocation5 + $0x128] sm:$0xff]  ;;  %2864 = vmatprep.subr.bf16.mxu0 %v2863_v62 }
  0x60   :  { %2856 = vmatprep.subr.bf16.mxu1 %v2855_v6  ;;  %v2867_v5 = vpack.c.bf16 %v141_v63, %v140_v58  ;;  %2866 = vmatpush3.bf16.msra.mxu0 %v2863_v62  ;;  %v151_v62 = vld [vmem:[#allocation5 + $0x178] sm:$0xff] }
  0x61   :  { %2466 = vmatmul.mubr.f32.gmra.mrb[12].mxu0 %v53_v9  ;;  %2514 = vmatmul.mubr.f32.gmra.mrb[12].mxu1 %v85_v10 }
  0x62   :  { %2468 = vmatprep.mubr.f32.mxu0 %v54_v11  ;;  %2516 = vmatprep.mubr.f32.mxu1 %v86_v12 }
  0x63   :  { %2858 = vmatpush3.bf16.msra.mxu1 %v2855_v6  ;;  %v142_v6 = vld [vmem:[#allocation5 + $0x130] sm:$0xff]  ;;  %2868 = vmatprep.subr.bf16.mxu0 %v2867_v5 }
  0x64   :  { %2860 = vmatprep.subr.bf16.mxu1 %v2859_v13  ;;  %2870 = vmatpush3.bf16.msra.mxu0 %v2867_v5 }
  0x65   :  { %2469 = vmatmul.mubr.f32.gmra.mrb[14].mxu0 %v55_v14  ;;  %2517 = vmatmul.mubr.f32.gmra.mrb[14].mxu1 %v87_v15 }
  0x66   :  { %2471 = vmatprep.mubr.f32.mxu0 %v56_v16  ;;  %2519 = vmatprep.mubr.f32.mxu1 %v88_v17 }
  0x67   :  { %2862 = vmatpush3.bf16.msra.mxu1 %v2859_v13  ;;  %v2871_v13 = vpack.c.bf16 %v143_v7, %v142_v6 }
  0x69   :  { %2472 = vmatmul.mubr.f32.gmra.mrb[16].mxu0 %v57_v18  ;;  %2520 = vmatmul.mubr.f32.gmra.mrb[16].mxu1 %v89_v19  ;;  %v144_v19 = vld [vmem:[#allocation5 + $0x140] sm:$0xff] }
  0x6a   :  { %2474 = vmatprep.mubr.f32.mxu0 %v58_v20  ;;  %2522 = vmatprep.mubr.f32.mxu1 %v90_v21  ;;  %v145_v20 = vld [vmem:[#allocation5 + $0x148] sm:$0xff] }
  0x6b   :  { %2872 = vmatprep.subr.bf16.mxu0 %v2871_v13 }
  0x6c   :  { %2874 = vmatpush3.bf16.msra.mxu0 %v2871_v13  ;;  %v153_v13 = vld [vmem:[#allocation5 + $0x188] sm:$0xff] }
  0x6d   :  { %2475 = vmatmul.mubr.f32.gmra.mrb[18].mxu0 %v59_v22  ;;  %2523 = vmatmul.mubr.f32.gmra.mrb[18].mxu1 %v91_v23 }
  0x6e   :  { %2477 = vmatprep.mubr.f32.mxu0 %v60_v24  ;;  %2525 = vmatprep.mubr.f32.mxu1 %v92_v25 }
  0x71   :  { %2478 = vmatmul.mubr.f32.gmra.mrb[20].mxu0 %v61_v26  ;;  %2526 = vmatmul.mubr.f32.gmra.mrb[20].mxu1 %v93_v27  ;;  %v2875_v27 = vpack.c.bf16 %v145_v20, %v144_v19 }
  0x72   :  { %2480 = vmatprep.mubr.f32.mxu0 %v62_v28  ;;  %2528 = vmatprep.mubr.f32.mxu1 %v94_v29 }
  0x73   :  { %2876 = vmatprep.subr.bf16.mxu0 %v2875_v27 }
  0x74   :  { %2878 = vmatpush3.bf16.msra.mxu0 %v2875_v27 }
  0x75   :  { %2481 = vmatmul.mubr.f32.gmra.mrb[22].mxu0 %v63_v30  ;;  %2529 = vmatmul.mubr.f32.gmra.mrb[22].mxu1 %v95_v31 }
  0x76   :  { %2483 = vmatprep.mubr.f32.mxu0 %v64_v32  ;;  %2531 = vmatprep.mubr.f32.mxu1 %v96_v33  ;;  %v146_v32 = vld [vmem:[#allocation5 + $0x150] sm:$0xff]  ;;  %v147_v33 = vld [vmem:[#allocation5 + $0x158] sm:$0xff] }
  0x79   :  { %2484 = vmatmul.mubr.f32.gmra.mrb[24].mxu0 %v65_v34  ;;  %2532 = vmatmul.mubr.f32.gmra.mrb[24].mxu1 %v97_v35 }
  0x7a   :  { %2486 = vmatprep.mubr.f32.mxu0 %v66_v36  ;;  %2534 = vmatprep.mubr.f32.mxu1 %v98_v37 }
  0x7d   :  { %2487 = vmatmul.mubr.f32.gmra.mrb[26].mxu0 %v67_v38  ;;  %2535 = vmatmul.mubr.f32.gmra.mrb[26].mxu1 %v99_v39 }
  0x7e   :  { %2489 = vmatprep.mubr.f32.mxu0 %v68_v40  ;;  %2537 = vmatprep.mubr.f32.mxu1 %v100_v41  ;;  %v2879_v40 = vpack.c.bf16 %v147_v33, %v146_v32 }
  0x80   :  { %2880 = vmatprep.subr.bf16.mxu0 %v2879_v40 }
  0x81   :  { %2490 = vmatmul.mubr.f32.gmra.mrb[28].mxu0 %v69_v42  ;;  %2538 = vmatmul.mubr.f32.gmra.mrb[28].mxu1 %v101_v43 }
  0x82   :  { %2492 = vmatprep.mubr.f32.mxu0 %v70_v44  ;;  %2540 = vmatprep.mubr.f32.mxu1 %v102_v45  ;;  %v148_v45 = vld [vmem:[#allocation5 + $0x160] sm:$0xff] }
  0x83   :  { %2882 = vmatpush3.bf16.msra.mxu0 %v2879_v40 }
  0x85   :  { %2493 = vmatmul.mubr.f32.gmra.mrb[30].mxu0 %v71_v46  ;;  %2541 = vmatmul.mubr.f32.gmra.mrb[30].mxu1 %v103_v47  ;;  %v149_v46 = vld [vmem:[#allocation5 + $0x168] sm:$0xff] }
  0x86   :  { %v2883_v56 = vpack.c.bf16 %v149_v46, %v148_v45 }
  0x88   :  { %2884 = vmatprep.subr.bf16.mxu0 %v2883_v56 }
  0x89   :  { %2886 = vmatpush3.bf16.msra.mxu0 %v2883_v56 }
 0x11c   :  { %v2449_v49 = vpop.f32.mrb[0].mxu0  ;;  %v2497_v50 = vpop.f32.mrb[0].mxu1 }
 0x11d   :  { %v231_v51 = vadd.f32 %v2449_v49, %v3294_v48  ;;  %v225_v52 = vpop.f32.mrb[1].mxu0  ;;  %v3298_v53 = vadd.f32 %v2497_v50, %v3294_v48  ;;  %v3300_v54 = vpop.f32.mrb[1].mxu1 }
 0x11e   :  { %v226_v55 = vadd.f32 %v3294_v48, %v225_v52 }
 0x11f   :  { %v545_v0 = vmax.f32 %v231_v51, 0.0 }
 0x120   :  { %v544_v59 = vmax.f32 %v226_v55, 0.0  ;;  %v2452_v60 = vpop.f32.mrb[2].mxu0  ;;  %v2500_v61 = vpop.f32.mrb[2].mxu1 }
 0x121   :  { %v241_v1 = vadd.f32 %v2452_v60, %v3294_v48  ;;  %v235_v2 = vpop.f32.mrb[3].mxu0  ;;  %v3305_v3 = vadd.f32 %v2500_v61, %v3294_v48  ;;  %v395_v4 = vpop.f32.mrb[3].mxu1  ;;  %v150_v61 = vld [vmem:[#allocation5 + $0x170] sm:$0xff] }
 0x122   :  { %v236_v8 = vadd.f32 %v3294_v48, %v235_v2  ;;  %2575 = vmatprep.mubr.f32.mxu1 %v544_v59  ;;  %v3309_v9 = vadd.f32 %v3294_v48, %v395_v4  ;;  %v2887_v6 = vpack.c.bf16 %v151_v62, %v150_v61 }
 0x123   :  { %2576 = vmatmul.mubr.f32.vlgmr.msra.gmra.mrb[32].mxu1 %v545_v0  ;;  %v547_v14 = vmax.f32 %v241_v1, 0.0 }
 0x124   :  { %v546_v10 = vmax.f32 %v236_v8, 0.0  ;;  %v2455_v11 = vpop.f32.mrb[4].mxu0  ;;  %v2503_v12 = vpop.f32.mrb[4].mxu1  ;;  %2888 = vmatprep.subr.bf16.mxu0 %v2887_v6 }
 0x125   :  { %v251_v15 = vadd.f32 %v2455_v11, %v3294_v48  ;;  %v245_v16 = vpop.f32.mrb[5].mxu0  ;;  %v3313_v17 = vadd.f32 %v2503_v12, %v3294_v48  ;;  %v405_v18 = vpop.f32.mrb[5].mxu1  ;;  %v152_v12 = vld [vmem:[#allocation5 + $0x180] sm:$0xff]  ;;  %2890 = vmatpush3.bf16.msra.mxu0 %v2887_v6 }
 0x126   :  { %v246_v21 = vadd.f32 %v3294_v48, %v245_v16  ;;  %2578 = vmatprep.mubr.f32.mxu1 %v546_v10  ;;  %v3317_v22 = vadd.f32 %v3294_v48, %v405_v18 }
 0x127   :  { %v549_v23 = vmax.f32 %v251_v15, 0.0  ;;  %2579 = vmatmul.mubr.f32.gmra.mrb[34].mxu1 %v547_v14 }
 0x128   :  { %v548_v24 = vmax.f32 %v246_v21, 0.0  ;;  %v2458_v25 = vpop.f32.mrb[6].mxu0  ;;  %v2506_v26 = vpop.f32.mrb[6].mxu1  ;;  %v2891_v21 = vpack.c.bf16 %v153_v13, %v152_v12 }
 0x129   :  { %v261_v28 = vadd.f32 %v2458_v25, %v3294_v48  ;;  %v255_v29 = vpop.f32.mrb[7].mxu0  ;;  %v3321_v30 = vadd.f32 %v2506_v26, %v3294_v48  ;;  %v415_v31 = vpop.f32.mrb[7].mxu1 }
 0x12a   :  { %v256_v34 = vadd.f32 %v3294_v48, %v255_v29  ;;  %2581 = vmatprep.mubr.f32.mxu1 %v548_v24  ;;  %v3325_v35 = vadd.f32 %v3294_v48, %v415_v31  ;;  %2892 = vmatprep.subr.bf16.mxu0 %v2891_v21 }
 0x12b   :  { %v551_v36 = vmax.f32 %v261_v28, 0.0  ;;  %2582 = vmatmul.mubr.f32.gmra.mrb[36].mxu1 %v549_v23  ;;  %2894 = vmatpush3.bf16.msra.mxu0 %v2891_v21 }
 0x12c   :  { %v550_v37 = vmax.f32 %v256_v34, 0.0  ;;  %v2461_v38 = vpop.f32.mrb[8].mxu0  ;;  %v2509_v39 = vpop.f32.mrb[8].mxu1 }
 0x12d   :  { %v271_v41 = vadd.f32 %v2461_v38, %v3294_v48  ;;  %v265_v42 = vpop.f32.mrb[9].mxu0  ;;  %v3329_v43 = vadd.f32 %v2509_v39, %v3294_v48  ;;  %v425_v44 = vpop.f32.mrb[9].mxu1 }
 0x12e   :  { %v266_v47 = vadd.f32 %v3294_v48, %v265_v42  ;;  %2584 = vmatprep.mubr.f32.mxu1 %v550_v37  ;;  %v3333_v49 = vadd.f32 %v3294_v48, %v425_v44 }
 0x12f   :  { %v553_v50 = vmax.f32 %v271_v41, 0.0  ;;  %2585 = vmatmul.mubr.f32.gmra.mrb[38].mxu1 %v551_v36 }
 0x130   :  { %v552_v51 = vmax.f32 %v266_v47, 0.0  ;;  %v2464_v52 = vpop.f32.mrb[10].mxu0  ;;  %v2512_v55 = vpop.f32.mrb[10].mxu1 }
 0x131   :  { %v281_v57 = vadd.f32 %v2464_v52, %v3294_v48  ;;  %v275_v58 = vpop.f32.mrb[11].mxu0  ;;  %v3337_v59 = vadd.f32 %v2512_v55, %v3294_v48  ;;  %v435_v60 = vpop.f32.mrb[11].mxu1 }
 0x132   :  { %v276_v63 = vadd.f32 %v3294_v48, %v275_v58  ;;  %2587 = vmatprep.mubr.f32.mxu1 %v552_v51  ;;  %v3341_v0 = vadd.f32 %v3294_v48, %v435_v60 }
 0x133   :  { %v555_v1 = vmax.f32 %v281_v57, 0.0  ;;  %2588 = vmatmul.mubr.f32.gmra.mrb[40].mxu1 %v553_v50 }
 0x134   :  { %v554_v2 = vmax.f32 %v276_v63, 0.0  ;;  %v2467_v4 = vpop.f32.mrb[12].mxu0  ;;  %v2515_v5 = vpop.f32.mrb[12].mxu1 }
 0x135   :  { %v291_v7 = vadd.f32 %v2467_v4, %v3294_v48  ;;  %v285_v8 = vpop.f32.mrb[13].mxu0  ;;  %v3345_v10 = vadd.f32 %v2515_v5, %v3294_v48  ;;  %v445_v11 = vpop.f32.mrb[13].mxu1 }
 0x136   :  { %v286_v14 = vadd.f32 %v3294_v48, %v285_v8  ;;  %2590 = vmatprep.mubr.f32.mxu1 %v554_v2  ;;  %v3349_v15 = vadd.f32 %v3294_v48, %v445_v11 }
 0x137   :  { %v557_v16 = vmax.f32 %v291_v7, 0.0  ;;  %2591 = vmatmul.mubr.f32.gmra.mrb[42].mxu1 %v555_v1 }
 0x138   :  { %v556_v18 = vmax.f32 %v286_v14, 0.0  ;;  %v2470_v19 = vpop.f32.mrb[14].mxu0  ;;  %v2518_v20 = vpop.f32.mrb[14].mxu1 }
 0x139   :  { %v301_v23 = vadd.f32 %v2470_v19, %v3294_v48  ;;  %v295_v24 = vpop.f32.mrb[15].mxu0  ;;  %v3353_v25 = vadd.f32 %v2518_v20, %v3294_v48  ;;  %v455_v26 = vpop.f32.mrb[15].mxu1 }
 0x13a   :  { %v296_v27 = vadd.f32 %v3294_v48, %v295_v24  ;;  %2593 = vmatprep.mubr.f32.mxu1 %v556_v18  ;;  %v3357_v28 = vadd.f32 %v3294_v48, %v455_v26 }
 0x13b   :  { %v559_v29 = vmax.f32 %v301_v23, 0.0  ;;  %2594 = vmatmul.mubr.f32.gmra.mrb[44].mxu1 %v557_v16 }
 0x13c   :  { %v558_v31 = vmax.f32 %v296_v27, 0.0  ;;  %v2473_v32 = vpop.f32.mrb[16].mxu0  ;;  %v2521_v33 = vpop.f32.mrb[16].mxu1 }
 0x13d   :  { %v311_v34 = vadd.f32 %v2473_v32, %v3294_v48  ;;  %v305_v36 = vpop.f32.mrb[17].mxu0  ;;  %v3361_v37 = vadd.f32 %v2521_v33, %v3294_v48  ;;  %v465_v38 = vpop.f32.mrb[17].mxu1 }
 0x13e   :  { %v306_v39 = vadd.f32 %v3294_v48, %v305_v36  ;;  %2596 = vmatprep.mubr.f32.mxu1 %v558_v31  ;;  %v3365_v40 = vadd.f32 %v3294_v48, %v465_v38 }
 0x13f   :  { %v561_v41 = vmax.f32 %v311_v34, 0.0  ;;  %2597 = vmatmul.mubr.f32.gmra.mrb[46].mxu1 %v559_v29 }
 0x140   :  { %v560_v42 = vmax.f32 %v306_v39, 0.0  ;;  %v2476_v44 = vpop.f32.mrb[18].mxu0  ;;  %v2524_v45 = vpop.f32.mrb[18].mxu1 }
 0x141   :  { %v321_v46 = vadd.f32 %v2476_v44, %v3294_v48  ;;  %v315_v47 = vpop.f32.mrb[19].mxu0  ;;  %v3369_v50 = vadd.f32 %v2524_v45, %v3294_v48  ;;  %v475_v51 = vpop.f32.mrb[19].mxu1 }
 0x142   :  { %v316_v52 = vadd.f32 %v3294_v48, %v315_v47  ;;  %2599 = vmatprep.mubr.f32.mxu1 %v560_v42  ;;  %v3373_v55 = vadd.f32 %v3294_v48, %v475_v51 }
 0x143   :  { %v563_v56 = vmax.f32 %v321_v46, 0.0  ;;  %2600 = vmatmul.mubr.f32.gmra.mrb[48].mxu1 %v561_v41 }
 0x144   :  { %v562_v57 = vmax.f32 %v316_v52, 0.0  ;;  %v2479_v58 = vpop.f32.mrb[20].mxu0  ;;  %v2527_v60 = vpop.f32.mrb[20].mxu1 }
 0x145   :  { %v331_v61 = vadd.f32 %v2479_v58, %v3294_v48  ;;  %v325_v62 = vpop.f32.mrb[21].mxu0  ;;  %v3377_v63 = vadd.f32 %v2527_v60, %v3294_v48  ;;  %v485_v1 = vpop.f32.mrb[21].mxu1 }
 0x146   :  { %v326_v2 = vadd.f32 %v3294_v48, %v325_v62  ;;  %2602 = vmatprep.mubr.f32.mxu1 %v562_v57  ;;  %v3381_v4 = vadd.f32 %v3294_v48, %v485_v1 }
 0x147   :  { %v565_v5 = vmax.f32 %v331_v61, 0.0  ;;  %2603 = vmatmul.mubr.f32.gmra.mrb[50].mxu1 %v563_v56 }
 0x148   :  { %v564_v6 = vmax.f32 %v326_v2, 0.0  ;;  %v2482_v7 = vpop.f32.mrb[22].mxu0  ;;  %v2530_v8 = vpop.f32.mrb[22].mxu1 }
 0x149   :  { %v341_v11 = vadd.f32 %v2482_v7, %v3294_v48  ;;  %v335_v12 = vpop.f32.mrb[23].mxu0  ;;  %v3385_v13 = vadd.f32 %v2530_v8, %v3294_v48  ;;  %v495_v14 = vpop.f32.mrb[23].mxu1  ;;  %v386_v7 = vadd.f32 %v3294_v48, %v3300_v54  ;;  %v577_v54 = vmax.f32 %v3298_v53, 0.0 }
 0x14a   :  { %v336_v16 = vadd.f32 %v3294_v48, %v335_v12  ;;  %2605 = vmatprep.mubr.f32.mxu1 %v564_v6  ;;  %v3389_v18 = vadd.f32 %v3294_v48, %v495_v14  ;;  %v584_v53 = vmax.f32 %v3333_v49, 0.0  ;;  %v591_v49 = vmax.f32 %v3353_v25, 0.0 }
 0x14b   :  { %v567_v19 = vmax.f32 %v341_v11, 0.0  ;;  %2606 = vmatmul.mubr.f32.gmra.mrb[52].mxu1 %v565_v5 }
 0x14c   :  { %v566_v20 = vmax.f32 %v336_v16, 0.0  ;;  %v2485_v21 = vpop.f32.mrb[24].mxu0  ;;  %v2533_v23 = vpop.f32.mrb[24].mxu1  ;;  %v598_v25 = vmax.f32 %v3389_v18, 0.0 }
 0x14d   :  { %v351_v24 = vadd.f32 %v2485_v21, %v3294_v48  ;;  %v345_v26 = vpop.f32.mrb[25].mxu0  ;;  %v3393_v27 = vadd.f32 %v2533_v23, %v3294_v48  ;;  %v505_v29 = vpop.f32.mrb[25].mxu1 }
 0x14e   :  { %v346_v31 = vadd.f32 %v3294_v48, %v345_v26  ;;  %2608 = vmatprep.mubr.f32.mxu1 %v566_v20  ;;  %v3397_v32 = vadd.f32 %v3294_v48, %v505_v29  ;;  %v578_v26 = vmax.f32 %v3309_v9, 0.0  ;;  %v579_v29 = vmax.f32 %v3305_v3, 0.0 }
 0x14f   :  { %v569_v33 = vmax.f32 %v351_v24, 0.0  ;;  %2609 = vmatmul.mubr.f32.gmra.mrb[54].mxu1 %v567_v19  ;;  %v576_v24 = vmax.f32 %v386_v7, 0.0  ;;  %v585_v9 = vmax.f32 %v3329_v43, 0.0  ;;  %v586_v3 = vmax.f32 %v3341_v0, 0.0 }
 0x150   :  { %v568_v34 = vmax.f32 %v346_v31, 0.0  ;;  %v2488_v36 = vpop.f32.mrb[26].mxu0  ;;  %v2536_v38 = vpop.f32.mrb[26].mxu1  ;;  %v580_v31 = vmax.f32 %v3317_v22, 0.0  ;;  %v587_v22 = vmax.f32 %v3337_v59, 0.0  ;;  %v592_v43 = vmax.f32 %v3365_v40, 0.0 }
 0x151   :  { %v361_v39 = vadd.f32 %v2488_v36, %v3294_v48  ;;  %v355_v41 = vpop.f32.mrb[27].mxu0  ;;  %v3401_v42 = vadd.f32 %v2536_v38, %v3294_v48  ;;  %v515_v44 = vpop.f32.mrb[27].mxu1  ;;  %v593_v0 = vmax.f32 %v3361_v37, 0.0  ;;  %v594_v59 = vmax.f32 %v3373_v55, 0.0 }
 0x152   :  { %v356_v45 = vadd.f32 %v3294_v48, %v355_v41  ;;  %2611 = vmatprep.mubr.f32.mxu1 %v568_v34  ;;  %v3405_v46 = vadd.f32 %v3294_v48, %v515_v44  ;;  %v583_v34 = vmax.f32 %v3321_v30, 0.0  ;;  %v590_v30 = vmax.f32 %v3357_v28, 0.0 }
 0x153   :  { %v571_v47 = vmax.f32 %v361_v39, 0.0  ;;  %2612 = vmatmul.mubr.f32.gmra.mrb[56].mxu1 %v569_v33  ;;  %v582_v33 = vmax.f32 %v3325_v35, 0.0  ;;  %v589_v35 = vmax.f32 %v3345_v10, 0.0  ;;  %v596_v10 = vmax.f32 %v3381_v4, 0.0 }
 0x154   :  { %v570_v51 = vmax.f32 %v356_v45, 0.0  ;;  %v2491_v52 = vpop.f32.mrb[28].mxu0  ;;  %v2539_v56 = vpop.f32.mrb[28].mxu1  ;;  %v597_v28 = vmax.f32 %v3377_v63, 0.0  ;;  %v599_v40 = vmax.f32 %v3385_v13, 0.0  ;;  %v600_v37 = vmax.f32 %v3397_v32, 0.0 }
 0x155   :  { %v371_v57 = vadd.f32 %v2491_v52, %v3294_v48  ;;  %v365_v58 = vpop.f32.mrb[29].mxu0  ;;  %v3409_v60 = vadd.f32 %v2539_v56, %v3294_v48  ;;  %v525_v61 = vpop.f32.mrb[29].mxu1  ;;  %v601_v55 = vmax.f32 %v3393_v27, 0.0  ;;  %v603_v4 = vmax.f32 %v3401_v42, 0.0  ;;  %v3456_v27 = vld [vmem:[#allocation5 + $0x108] ss:$0 sm:$0xff] }
 0x156   :  { %v366_v62 = vadd.f32 %v3294_v48, %v365_v58  ;;  %2614 = vmatprep.mubr.f32.mxu1 %v570_v51  ;;  %v3413_v1 = vadd.f32 %v3294_v48, %v525_v61 }
 0x157   :  { %v573_v2 = vmax.f32 %v371_v57, 0.0  ;;  %2615 = vmatmul.mubr.f32.gmra.mrb[58].mxu1 %v571_v47  ;;  %v605_v18 = vmax.f32 %v3409_v60, 0.0 }
 0x158   :  { %v572_v5 = vmax.f32 %v366_v62, 0.0  ;;  %v2494_v6 = vpop.f32.mrb[30].mxu0  ;;  %v2542_v8 = vpop.f32.mrb[30].mxu1  ;;  %v604_v63 = vmax.f32 %v3413_v1, 0.0 }
 0x159   :  { %v381_v11 = vadd.f32 %v2494_v6, %v3294_v48  ;;  %v375_v12 = vpop.f32.mrb[31].mxu0  ;;  %v3419_v14 = vadd.f32 %v2542_v8, %v3294_v48  ;;  %v535_v16 = vpop.f32.mrb[31].mxu1 }
 0x15a   :  { %v376_v19 = vadd.f32 %v3294_v48, %v375_v12  ;;  %2617 = vmatprep.mubr.f32.mxu1 %v572_v5  ;;  %v3423_v20 = vadd.f32 %v3294_v48, %v535_v16  ;;  %v581_v48 = vmax.f32 %v3313_v17, 0.0  ;;  %v588_v17 = vmax.f32 %v3349_v15, 0.0 }
 0x15b   :  { %v575_v21 = vmax.f32 %v381_v11, 0.0  ;;  %2618 = vmatmul.mubr.f32.gmra.mrb[60].mxu1 %v573_v2  ;;  %v595_v15 = vmax.f32 %v3369_v50, 0.0  ;;  %v602_v50 = vmax.f32 %v3405_v46, 0.0  ;;  %v607_v32 = vmax.f32 %v3419_v14, 0.0 }
 0x15c   :  { %v574_v23 = vmax.f32 %v376_v19, 0.0  ;;  %v606_v13 = vmax.f32 %v3423_v20, 0.0 }
 0x15e   :  { %2620 = vmatprep.mubr.f32.mxu1 %v574_v23 }
 0x15f   :  { %2621 = vmatmul.mubr.f32.gmra.mrb[62].mxu1 %v575_v21 }
 0x160   :  { %2623 = vmatprep.mubr.f32.mxu1 %v576_v24 }
 0x163   :  { %2624 = vmatmul.mubr.f32.gmra.mrb[64].mxu1 %v577_v54 }
 0x164   :  { %2626 = vmatprep.mubr.f32.mxu1 %v578_v26 }
 0x167   :  { %2627 = vmatmul.mubr.f32.gmra.mrb[66].mxu1 %v579_v29 }
 0x168   :  { %2629 = vmatprep.mubr.f32.mxu1 %v580_v31 }
 0x16b   :  { %2630 = vmatmul.mubr.f32.gmra.mrb[68].mxu1 %v581_v48 }
 0x16c   :  { %2632 = vmatprep.mubr.f32.mxu1 %v582_v33 }
 0x16f   :  { %2633 = vmatmul.mubr.f32.gmra.mrb[70].mxu1 %v583_v34 }
 0x170   :  { %2635 = vmatprep.mubr.f32.mxu1 %v584_v53 }
 0x173   :  { %2636 = vmatmul.mubr.f32.gmra.mrb[72].mxu1 %v585_v9 }
 0x174   :  { %2638 = vmatprep.mubr.f32.mxu1 %v586_v3 }
 0x177   :  { %2639 = vmatmul.mubr.f32.gmra.mrb[74].mxu1 %v587_v22 }
 0x178   :  { %2641 = vmatprep.mubr.f32.mxu1 %v588_v17 }
 0x17b   :  { %2642 = vmatmul.mubr.f32.gmra.mrb[76].mxu1 %v589_v35 }
 0x17c   :  { %2644 = vmatprep.mubr.f32.mxu1 %v590_v30 }
 0x17f   :  { %2645 = vmatmul.mubr.f32.gmra.mrb[78].mxu1 %v591_v49 }
 0x180   :  { %2647 = vmatprep.mubr.f32.mxu1 %v592_v43 }
 0x183   :  { %2648 = vmatmul.mubr.f32.gmra.mrb[80].mxu1 %v593_v0 }
 0x184   :  { %2650 = vmatprep.mubr.f32.mxu1 %v594_v59 }
 0x187   :  { %2651 = vmatmul.mubr.f32.gmra.mrb[82].mxu1 %v595_v15 }
 0x188   :  { %2653 = vmatprep.mubr.f32.mxu1 %v596_v10 }
 0x18b   :  { %2654 = vmatmul.mubr.f32.gmra.mrb[84].mxu1 %v597_v28 }
 0x18c   :  { %2656 = vmatprep.mubr.f32.mxu1 %v598_v25 }
 0x18f   :  { %2657 = vmatmul.mubr.f32.gmra.mrb[86].mxu1 %v599_v40 }
 0x190   :  { %2659 = vmatprep.mubr.f32.mxu1 %v600_v37 }
 0x193   :  { %2660 = vmatmul.mubr.f32.gmra.mrb[88].mxu1 %v601_v55 }
 0x194   :  { %2662 = vmatprep.mubr.f32.mxu1 %v602_v50 }
 0x197   :  { %2663 = vmatmul.mubr.f32.gmra.mrb[90].mxu1 %v603_v4 }
 0x198   :  { %2665 = vmatprep.mubr.f32.mxu1 %v604_v63 }
 0x19b   :  { %2666 = vmatmul.mubr.f32.gmra.mrb[92].mxu1 %v605_v18 }
 0x19c   :  { %2668 = vmatprep.mubr.f32.mxu1 %v606_v13 }
 0x19f   :  { %2669 = vmatmul.mubr.f32.gmra.mrb[94].mxu1 %v607_v32 }
 0x1f6   :  { %v2577_v36 = vpop.f32.mrb[32].mxu1 }
 0x1f7   :  { %v684_v38 = vadd.f32 %v2577_v36, %v3456_v27  ;;  %v678_v39 = vpop.f32.mrb[33].mxu1 }
 0x1f8   :  { %v679_v41 = vadd.f32 %v3456_v27, %v678_v39 }
 0x1f9   :  { %v998_v45 = vmax.f32 %v684_v38, 0.0 }
 0x1fa   :  { %v997_v42 = vmax.f32 %v679_v41, 0.0  ;;  %v2580_v44 = vpop.f32.mrb[34].mxu1 }
 0x1fb   :  { %v694_v46 = vadd.f32 %v2580_v44, %v3456_v27  ;;  %v688_v47 = vpop.f32.mrb[35].mxu1 }
 0x1fc   :  { %v689_v51 = vadd.f32 %v3456_v27, %v688_v47  ;;  %2703 = vmatprep.mubr.f32.mxu0 %v997_v42 }
 0x1fd   :  { %2704 = vmatmul.mubr.f32.vlgmr.msra.gmra.mrb[32].mxu0 %v998_v45  ;;  %v1000_v57 = vmax.f32 %v694_v46, 0.0 }
 0x1fe   :  { %v999_v52 = vmax.f32 %v689_v51, 0.0  ;;  %v2583_v56 = vpop.f32.mrb[36].mxu1 }
 0x1ff   :  { %v704_v58 = vadd.f32 %v2583_v56, %v3456_v27  ;;  %v698_v60 = vpop.f32.mrb[37].mxu1 }
 0x200   :  { %v699_v61 = vadd.f32 %v3456_v27, %v698_v60  ;;  %2706 = vmatprep.mubr.f32.mxu0 %v999_v52 }
 0x201   :  { %v1002_v62 = vmax.f32 %v704_v58, 0.0  ;;  %2707 = vmatmul.mubr.f32.gmra.mrb[34].mxu0 %v1000_v57 }
 0x202   :  { %v1001_v1 = vmax.f32 %v699_v61, 0.0  ;;  %v2586_v2 = vpop.f32.mrb[38].mxu1 }
 0x203   :  { %v714_v5 = vadd.f32 %v2586_v2, %v3456_v27  ;;  %v708_v6 = vpop.f32.mrb[39].mxu1 }
 0x204   :  { %v709_v7 = vadd.f32 %v3456_v27, %v708_v6  ;;  %2709 = vmatprep.mubr.f32.mxu0 %v1001_v1 }
 0x205   :  { %v1004_v8 = vmax.f32 %v714_v5, 0.0  ;;  %2710 = vmatmul.mubr.f32.gmra.mrb[36].mxu0 %v1002_v62 }
 0x206   :  { %v1003_v11 = vmax.f32 %v709_v7, 0.0  ;;  %v2589_v12 = vpop.f32.mrb[40].mxu1 }
 0x207   :  { %v724_v14 = vadd.f32 %v2589_v12, %v3456_v27  ;;  %v718_v16 = vpop.f32.mrb[41].mxu1 }
 0x208   :  { %v719_v19 = vadd.f32 %v3456_v27, %v718_v16  ;;  %2712 = vmatprep.mubr.f32.mxu0 %v1003_v11 }
 0x209   :  { %v1006_v20 = vmax.f32 %v724_v14, 0.0  ;;  %2713 = vmatmul.mubr.f32.gmra.mrb[38].mxu0 %v1004_v8 }
 0x20a   :  { %v1005_v21 = vmax.f32 %v719_v19, 0.0  ;;  %v2592_v23 = vpop.f32.mrb[42].mxu1 }
 0x20b   :  { %v734_v24 = vadd.f32 %v2592_v23, %v3456_v27  ;;  %v728_v54 = vpop.f32.mrb[43].mxu1 }
 0x20c   :  { %v729_v26 = vadd.f32 %v3456_v27, %v728_v54  ;;  %2715 = vmatprep.mubr.f32.mxu0 %v1005_v21 }
 0x20d   :  { %v1008_v29 = vmax.f32 %v734_v24, 0.0  ;;  %2716 = vmatmul.mubr.f32.gmra.mrb[40].mxu0 %v1006_v20 }
 0x20e   :  { %v1007_v31 = vmax.f32 %v729_v26, 0.0  ;;  %v2595_v48 = vpop.f32.mrb[44].mxu1 }
 0x20f   :  { %v744_v33 = vadd.f32 %v2595_v48, %v3456_v27  ;;  %v738_v34 = vpop.f32.mrb[45].mxu1 }
 0x210   :  { %v739_v53 = vadd.f32 %v3456_v27, %v738_v34  ;;  %2718 = vmatprep.mubr.f32.mxu0 %v1007_v31 }
 0x211   :  { %v1010_v9 = vmax.f32 %v744_v33, 0.0  ;;  %2719 = vmatmul.mubr.f32.gmra.mrb[42].mxu0 %v1008_v29 }
 0x212   :  { %v1009_v3 = vmax.f32 %v739_v53, 0.0  ;;  %v2598_v22 = vpop.f32.mrb[46].mxu1 }
 0x213   :  { %v754_v17 = vadd.f32 %v2598_v22, %v3456_v27  ;;  %v748_v35 = vpop.f32.mrb[47].mxu1 }
 0x214   :  { %v749_v30 = vadd.f32 %v3456_v27, %v748_v35  ;;  %2721 = vmatprep.mubr.f32.mxu0 %v1009_v3 }
 0x215   :  { %v1012_v49 = vmax.f32 %v754_v17, 0.0  ;;  %2722 = vmatmul.mubr.f32.gmra.mrb[44].mxu0 %v1010_v9 }
 0x216   :  { %v1011_v43 = vmax.f32 %v749_v30, 0.0  ;;  %v2601_v0 = vpop.f32.mrb[48].mxu1 }
 0x217   :  { %v764_v59 = vadd.f32 %v2601_v0, %v3456_v27  ;;  %v758_v15 = vpop.f32.mrb[49].mxu1 }
 0x218   :  { %v759_v10 = vadd.f32 %v3456_v27, %v758_v15  ;;  %2724 = vmatprep.mubr.f32.mxu0 %v1011_v43 }
 0x219   :  { %v1014_v28 = vmax.f32 %v764_v59, 0.0  ;;  %2725 = vmatmul.mubr.f32.gmra.mrb[46].mxu0 %v1012_v49 }
 0x21a   :  { %v1013_v25 = vmax.f32 %v759_v10, 0.0  ;;  %v2604_v40 = vpop.f32.mrb[50].mxu1 }
 0x21b   :  { %v774_v37 = vadd.f32 %v2604_v40, %v3456_v27  ;;  %v768_v55 = vpop.f32.mrb[51].mxu1 }
 0x21c   :  { %v769_v50 = vadd.f32 %v3456_v27, %v768_v55  ;;  %2727 = vmatprep.mubr.f32.mxu0 %v1013_v25 }
 0x21d   :  { %v1016_v4 = vmax.f32 %v774_v37, 0.0  ;;  %2728 = vmatmul.mubr.f32.gmra.mrb[48].mxu0 %v1014_v28 }
 0x21e   :  { %v1015_v63 = vmax.f32 %v769_v50, 0.0  ;;  %v2607_v18 = vpop.f32.mrb[52].mxu1 }
 0x21f   :  { %v784_v13 = vadd.f32 %v2607_v18, %v3456_v27  ;;  %v778_v32 = vpop.f32.mrb[53].mxu1 }
 0x220   :  { %v779_v36 = vadd.f32 %v3456_v27, %v778_v32  ;;  %2730 = vmatprep.mubr.f32.mxu0 %v1015_v63 }
 0x221   :  { %v1018_v38 = vmax.f32 %v784_v13, 0.0  ;;  %2731 = vmatmul.mubr.f32.gmra.mrb[50].mxu0 %v1016_v4 }
 0x222   :  { %v1017_v39 = vmax.f32 %v779_v36, 0.0  ;;  %v2610_v41 = vpop.f32.mrb[54].mxu1 }
 0x223   :  { %v794_v42 = vadd.f32 %v2610_v41, %v3456_v27  ;;  %v788_v44 = vpop.f32.mrb[55].mxu1 }
 0x224   :  { %v789_v45 = vadd.f32 %v3456_v27, %v788_v44  ;;  %2733 = vmatprep.mubr.f32.mxu0 %v1017_v39 }
 0x225   :  { %v1020_v46 = vmax.f32 %v794_v42, 0.0  ;;  %2734 = vmatmul.mubr.f32.gmra.mrb[52].mxu0 %v1018_v38 }
 0x226   :  { %v1019_v47 = vmax.f32 %v789_v45, 0.0  ;;  %v2613_v51 = vpop.f32.mrb[56].mxu1 }
 0x227   :  { %v804_v52 = vadd.f32 %v2613_v51, %v3456_v27  ;;  %v798_v56 = vpop.f32.mrb[57].mxu1 }
 0x228   :  { %v799_v57 = vadd.f32 %v3456_v27, %v798_v56  ;;  %2736 = vmatprep.mubr.f32.mxu0 %v1019_v47 }
 0x229   :  { %v1022_v58 = vmax.f32 %v804_v52, 0.0  ;;  %2737 = vmatmul.mubr.f32.gmra.mrb[54].mxu0 %v1020_v46 }
 0x22a   :  { %v1021_v60 = vmax.f32 %v799_v57, 0.0  ;;  %v2616_v61 = vpop.f32.mrb[58].mxu1 }
 0x22b   :  { %v814_v62 = vadd.f32 %v2616_v61, %v3456_v27  ;;  %v808_v1 = vpop.f32.mrb[59].mxu1 }
 0x22c   :  { %v809_v2 = vadd.f32 %v3456_v27, %v808_v1  ;;  %2739 = vmatprep.mubr.f32.mxu0 %v1021_v60 }
 0x22d   :  { %v1024_v5 = vmax.f32 %v814_v62, 0.0  ;;  %2740 = vmatmul.mubr.f32.gmra.mrb[56].mxu0 %v1022_v58 }
 0x22e   :  { %v1023_v6 = vmax.f32 %v809_v2, 0.0  ;;  %v2619_v7 = vpop.f32.mrb[60].mxu1 }
 0x22f   :  { %v824_v8 = vadd.f32 %v2619_v7, %v3456_v27  ;;  %v818_v11 = vpop.f32.mrb[61].mxu1 }
 0x230   :  { %v819_v12 = vadd.f32 %v3456_v27, %v818_v11  ;;  %2742 = vmatprep.mubr.f32.mxu0 %v1023_v6 }
 0x231   :  { %v1026_v14 = vmax.f32 %v824_v8, 0.0  ;;  %2743 = vmatmul.mubr.f32.gmra.mrb[58].mxu0 %v1024_v5 }
 0x232   :  { %v1025_v16 = vmax.f32 %v819_v12, 0.0  ;;  %v2622_v19 = vpop.f32.mrb[62].mxu1 }
 0x233   :  { %v834_v20 = vadd.f32 %v2622_v19, %v3456_v27  ;;  %v828_v21 = vpop.f32.mrb[63].mxu1 }
 0x234   :  { %v829_v23 = vadd.f32 %v3456_v27, %v828_v21  ;;  %2745 = vmatprep.mubr.f32.mxu0 %v1025_v16 }
 0x235   :  { %v1028_v24 = vmax.f32 %v834_v20, 0.0  ;;  %2746 = vmatmul.mubr.f32.gmra.mrb[60].mxu0 %v1026_v14 }
 0x236   :  { %v1027_v54 = vmax.f32 %v829_v23, 0.0  ;;  %v2625_v26 = vpop.f32.mrb[64].mxu1 }
 0x237   :  { %v844_v29 = vadd.f32 %v2625_v26, %v3456_v27  ;;  %v838_v31 = vpop.f32.mrb[65].mxu1 }
 0x238   :  { %v839_v48 = vadd.f32 %v3456_v27, %v838_v31  ;;  %2748 = vmatprep.mubr.f32.mxu0 %v1027_v54 }
 0x239   :  { %v1030_v33 = vmax.f32 %v844_v29, 0.0  ;;  %2749 = vmatmul.mubr.f32.gmra.mrb[62].mxu0 %v1028_v24 }
 0x23a   :  { %v1029_v34 = vmax.f32 %v839_v48, 0.0  ;;  %v2628_v53 = vpop.f32.mrb[66].mxu1 }
 0x23b   :  { %v854_v9 = vadd.f32 %v2628_v53, %v3456_v27  ;;  %v848_v3 = vpop.f32.mrb[67].mxu1 }
 0x23c   :  { %v849_v22 = vadd.f32 %v3456_v27, %v848_v3  ;;  %2751 = vmatprep.mubr.f32.mxu0 %v1029_v34 }
 0x23d   :  { %v1032_v17 = vmax.f32 %v854_v9, 0.0  ;;  %2752 = vmatmul.mubr.f32.gmra.mrb[64].mxu0 %v1030_v33 }
 0x23e   :  { %v1031_v35 = vmax.f32 %v849_v22, 0.0  ;;  %v2631_v30 = vpop.f32.mrb[68].mxu1 }
 0x23f   :  { %v864_v49 = vadd.f32 %v2631_v30, %v3456_v27  ;;  %v858_v43 = vpop.f32.mrb[69].mxu1 }
 0x240   :  { %v859_v0 = vadd.f32 %v3456_v27, %v858_v43  ;;  %2754 = vmatprep.mubr.f32.mxu0 %v1031_v35 }
 0x241   :  { %v1034_v59 = vmax.f32 %v864_v49, 0.0  ;;  %2755 = vmatmul.mubr.f32.gmra.mrb[66].mxu0 %v1032_v17 }
 0x242   :  { %v1033_v15 = vmax.f32 %v859_v0, 0.0  ;;  %v2634_v10 = vpop.f32.mrb[70].mxu1 }
 0x243   :  { %v874_v28 = vadd.f32 %v2634_v10, %v3456_v27  ;;  %v868_v25 = vpop.f32.mrb[71].mxu1 }
 0x244   :  { %v869_v40 = vadd.f32 %v3456_v27, %v868_v25  ;;  %2757 = vmatprep.mubr.f32.mxu0 %v1033_v15 }
 0x245   :  { %v1036_v37 = vmax.f32 %v874_v28, 0.0  ;;  %2758 = vmatmul.mubr.f32.gmra.mrb[68].mxu0 %v1034_v59 }
 0x246   :  { %v1035_v55 = vmax.f32 %v869_v40, 0.0  ;;  %v2637_v50 = vpop.f32.mrb[72].mxu1 }
 0x247   :  { %v884_v4 = vadd.f32 %v2637_v50, %v3456_v27  ;;  %v878_v63 = vpop.f32.mrb[73].mxu1 }
 0x248   :  { %v879_v18 = vadd.f32 %v3456_v27, %v878_v63  ;;  %2760 = vmatprep.mubr.f32.mxu0 %v1035_v55 }
 0x249   :  { %v1038_v13 = vmax.f32 %v884_v4, 0.0  ;;  %2761 = vmatmul.mubr.f32.gmra.mrb[70].mxu0 %v1036_v37 }
 0x24a   :  { %v1037_v32 = vmax.f32 %v879_v18, 0.0  ;;  %v2640_v36 = vpop.f32.mrb[74].mxu1 }
 0x24b   :  { %v894_v38 = vadd.f32 %v2640_v36, %v3456_v27  ;;  %v888_v39 = vpop.f32.mrb[75].mxu1 }
 0x24c   :  { %v889_v41 = vadd.f32 %v3456_v27, %v888_v39  ;;  %2763 = vmatprep.mubr.f32.mxu0 %v1037_v32 }
 0x24d   :  { %v1040_v42 = vmax.f32 %v894_v38, 0.0  ;;  %2764 = vmatmul.mubr.f32.gmra.mrb[72].mxu0 %v1038_v13 }
 0x24e   :  { %v1039_v44 = vmax.f32 %v889_v41, 0.0  ;;  %v2643_v45 = vpop.f32.mrb[76].mxu1  ;;  %v3522_v41 = vld [vmem:[#allocation5 + $0x190] ss:$0 sm:$0xff] }
 0x24f   :  { %v904_v46 = vadd.f32 %v2643_v45, %v3456_v27  ;;  %v898_v47 = vpop.f32.mrb[77].mxu1 }
 0x250   :  { %v899_v51 = vadd.f32 %v3456_v27, %v898_v47  ;;  %2766 = vmatprep.mubr.f32.mxu0 %v1039_v44 }
 0x251   :  { %v1042_v52 = vmax.f32 %v904_v46, 0.0  ;;  %2767 = vmatmul.mubr.f32.gmra.mrb[74].mxu0 %v1040_v42 }
 0x252   :  { %v1041_v56 = vmax.f32 %v899_v51, 0.0  ;;  %v2646_v57 = vpop.f32.mrb[78].mxu1 }
 0x253   :  { %v914_v58 = vadd.f32 %v2646_v57, %v3456_v27  ;;  %v908_v60 = vpop.f32.mrb[79].mxu1 }
 0x254   :  { %v909_v61 = vadd.f32 %v3456_v27, %v908_v60  ;;  %2769 = vmatprep.mubr.f32.mxu0 %v1041_v56 }
 0x255   :  { %v1044_v62 = vmax.f32 %v914_v58, 0.0  ;;  %2770 = vmatmul.mubr.f32.gmra.mrb[76].mxu0 %v1042_v52 }
 0x256   :  { %v1043_v1 = vmax.f32 %v909_v61, 0.0  ;;  %v2649_v2 = vpop.f32.mrb[80].mxu1 }
 0x257   :  { %v924_v5 = vadd.f32 %v2649_v2, %v3456_v27  ;;  %v918_v6 = vpop.f32.mrb[81].mxu1 }
 0x258   :  { %v919_v7 = vadd.f32 %v3456_v27, %v918_v6  ;;  %2772 = vmatprep.mubr.f32.mxu0 %v1043_v1 }
 0x259   :  { %v1046_v8 = vmax.f32 %v924_v5, 0.0  ;;  %2773 = vmatmul.mubr.f32.gmra.mrb[78].mxu0 %v1044_v62 }
 0x25a   :  { %v1045_v11 = vmax.f32 %v919_v7, 0.0  ;;  %v2652_v12 = vpop.f32.mrb[82].mxu1 }
 0x25b   :  { %v934_v14 = vadd.f32 %v2652_v12, %v3456_v27  ;;  %v928_v16 = vpop.f32.mrb[83].mxu1 }
 0x25c   :  { %v929_v19 = vadd.f32 %v3456_v27, %v928_v16  ;;  %2775 = vmatprep.mubr.f32.mxu0 %v1045_v11 }
 0x25d   :  { %v1048_v20 = vmax.f32 %v934_v14, 0.0  ;;  %2776 = vmatmul.mubr.f32.gmra.mrb[80].mxu0 %v1046_v8 }
 0x25e   :  { %v1047_v21 = vmax.f32 %v929_v19, 0.0  ;;  %v2655_v23 = vpop.f32.mrb[84].mxu1 }
 0x25f   :  { %v944_v24 = vadd.f32 %v2655_v23, %v3456_v27  ;;  %v938_v54 = vpop.f32.mrb[85].mxu1 }
 0x260   :  { %v939_v26 = vadd.f32 %v3456_v27, %v938_v54  ;;  %2778 = vmatprep.mubr.f32.mxu0 %v1047_v21 }
 0x261   :  { %v1050_v29 = vmax.f32 %v944_v24, 0.0  ;;  %2779 = vmatmul.mubr.f32.gmra.mrb[82].mxu0 %v1048_v20 }
 0x262   :  { %v1049_v31 = vmax.f32 %v939_v26, 0.0  ;;  %v2658_v48 = vpop.f32.mrb[86].mxu1 }
 0x263   :  { %v954_v33 = vadd.f32 %v2658_v48, %v3456_v27  ;;  %v948_v34 = vpop.f32.mrb[87].mxu1 }
 0x264   :  { %v949_v53 = vadd.f32 %v3456_v27, %v948_v34  ;;  %2781 = vmatprep.mubr.f32.mxu0 %v1049_v31 }
 0x265   :  { %v1052_v9 = vmax.f32 %v954_v33, 0.0  ;;  %2782 = vmatmul.mubr.f32.gmra.mrb[84].mxu0 %v1050_v29 }
 0x266   :  { %v1051_v3 = vmax.f32 %v949_v53, 0.0  ;;  %v2661_v22 = vpop.f32.mrb[88].mxu1 }
 0x267   :  { %v964_v17 = vadd.f32 %v2661_v22, %v3456_v27  ;;  %v958_v35 = vpop.f32.mrb[89].mxu1 }
 0x268   :  { %v959_v30 = vadd.f32 %v3456_v27, %v958_v35  ;;  %2784 = vmatprep.mubr.f32.mxu0 %v1051_v3 }
 0x269   :  { %v1054_v49 = vmax.f32 %v964_v17, 0.0  ;;  %2785 = vmatmul.mubr.f32.gmra.mrb[86].mxu0 %v1052_v9 }
 0x26a   :  { %v1053_v43 = vmax.f32 %v959_v30, 0.0  ;;  %v2664_v0 = vpop.f32.mrb[90].mxu1 }
 0x26b   :  { %v974_v59 = vadd.f32 %v2664_v0, %v3456_v27  ;;  %v968_v15 = vpop.f32.mrb[91].mxu1 }
 0x26c   :  { %v969_v10 = vadd.f32 %v3456_v27, %v968_v15  ;;  %2787 = vmatprep.mubr.f32.mxu0 %v1053_v43 }
 0x26d   :  { %v1056_v28 = vmax.f32 %v974_v59, 0.0  ;;  %2788 = vmatmul.mubr.f32.gmra.mrb[88].mxu0 %v1054_v49 }
 0x26e   :  { %v1055_v25 = vmax.f32 %v969_v10, 0.0  ;;  %v2667_v40 = vpop.f32.mrb[92].mxu1 }
 0x26f   :  { %v984_v37 = vadd.f32 %v2667_v40, %v3456_v27  ;;  %v978_v55 = vpop.f32.mrb[93].mxu1 }
 0x270   :  { %v979_v50 = vadd.f32 %v3456_v27, %v978_v55  ;;  %2790 = vmatprep.mubr.f32.mxu0 %v1055_v25 }
 0x271   :  { %v1058_v4 = vmax.f32 %v984_v37, 0.0  ;;  %2791 = vmatmul.mubr.f32.gmra.mrb[90].mxu0 %v1056_v28 }
 0x272   :  { %v1057_v63 = vmax.f32 %v979_v50, 0.0  ;;  %v2670_v18 = vpop.f32.mrb[94].mxu1 }
 0x273   :  { %v994_v13 = vadd.f32 %v2670_v18, %v3456_v27  ;;  %v988_v32 = vpop.f32.mrb[95].mxu1 }
 0x274   :  { %v989_v36 = vadd.f32 %v3456_v27, %v988_v32  ;;  %2793 = vmatprep.mubr.f32.mxu0 %v1057_v63 }
 0x275   :  { %v1060_v38 = vmax.f32 %v994_v13, 0.0  ;;  %2794 = vmatmul.mubr.f32.gmra.mrb[92].mxu0 %v1058_v4 }
 0x276   :  { %v1059_v39 = vmax.f32 %v989_v36, 0.0 }
 0x278   :  { %2796 = vmatprep.mubr.f32.mxu0 %v1059_v39 }
 0x279   :  { %2797 = vmatmul.mubr.f32.gmra.mrb[94].mxu0 %v1060_v38 }
 0x2d0   :  { %v2705_v42 = vpop.f32.mrb[32].mxu0 }
 0x2d1   :  { %v3525_v44 = vadd.f32 %v2705_v42, %v3522_v41  ;;  %v1131_v45 = vpop.f32.mrb[33].mxu0 }
 0x2d2   :  { %v3529_v47 = vadd.f32 %v3522_v41, %v1131_v45 }
 0x2d3   :  { %1452 = vmax.xlane.f32.xlu0 %v3525_v44 }
 0x2d4   :  { %v2708_v46 = vpop.f32.mrb[34].mxu0 }
 0x2d5   :  { %v3532_v27 = vadd.f32 %v2708_v46, %v3522_v41  ;;  %v1141_v51 = vpop.f32.mrb[35].mxu0 }
 0x2d6   :  { %v3537_v56 = vadd.f32 %v3522_v41, %v1141_v51 }
 0x2d7   :  { %1456 = vmax.xlane.f32.xlu1 %v3532_v27  ;;  %1450 = vmax.xlane.f32.xlu0 %v3529_v47 }
 0x2d8   :  { %v2711_v52 = vpop.f32.mrb[36].mxu0 }
 0x2d9   :  { %v1151_v57 = vpop.f32.mrb[37].mxu0  ;;  %v3545_v61 = vadd.f32 %v2711_v52, %v3522_v41 }
 0x2da   :  { %v3540_v58 = vadd.f32 %v3522_v41, %v1151_v57 }
 0x2db   :  { %1454 = vmax.xlane.f32.xlu1 %v3537_v56 }
 0x2dc   :  { %v2714_v60 = vpop.f32.mrb[38].mxu0  ;;  %1458 = vmax.xlane.f32.xlu0 %v3540_v58 }
 0x2dd   :  { %v1161_v62 = vpop.f32.mrb[39].mxu0  ;;  %v3553_v5 = vadd.f32 %v2714_v60, %v3522_v41 }
 0x2de   :  { %v3548_v1 = vadd.f32 %v3522_v41, %v1161_v62 }
 0x2df   :  { %1460 = vmax.xlane.f32.xlu1 %v3545_v61 }
 0x2e0   :  { %v2717_v2 = vpop.f32.mrb[40].mxu0  ;;  %1462 = vmax.xlane.f32.xlu0 %v3548_v1 }
 0x2e1   :  { %v1171_v6 = vpop.f32.mrb[41].mxu0  ;;  %v3561_v11 = vadd.f32 %v2717_v2, %v3522_v41 }
 0x2e2   :  { %v3556_v7 = vadd.f32 %v3522_v41, %v1171_v6 }
 0x2e3   :  { %1464 = vmax.xlane.f32.xlu1 %v3553_v5 }
 0x2e4   :  { %v2720_v8 = vpop.f32.mrb[42].mxu0  ;;  %1466 = vmax.xlane.f32.xlu0 %v3556_v7 }
 0x2e5   :  { %v1181_v12 = vpop.f32.mrb[43].mxu0  ;;  %v3569_v19 = vadd.f32 %v2720_v8, %v3522_v41 }
 0x2e6   :  { %v3564_v14 = vadd.f32 %v3522_v41, %v1181_v12 }
 0x2e7   :  { %1468 = vmax.xlane.f32.xlu1 %v3561_v11 }
 0x2e8   :  { %v2723_v16 = vpop.f32.mrb[44].mxu0  ;;  %1470 = vmax.xlane.f32.xlu0 %v3564_v14 }
 0x2e9   :  { %v1191_v20 = vpop.f32.mrb[45].mxu0  ;;  %v3577_v24 = vadd.f32 %v2723_v16, %v3522_v41 }
 0x2ea   :  { %v3572_v21 = vadd.f32 %v3522_v41, %v1191_v20 }
 0x2eb   :  { %1472 = vmax.xlane.f32.xlu1 %v3569_v19 }
 0x2ec   :  { %v2726_v23 = vpop.f32.mrb[46].mxu0  ;;  %1474 = vmax.xlane.f32.xlu0 %v3572_v21 }
 0x2ed   :  { %v1201_v54 = vpop.f32.mrb[47].mxu0  ;;  %v3585_v31 = vadd.f32 %v2726_v23, %v3522_v41 }
 0x2ee   :  { %v3580_v26 = vadd.f32 %v3522_v41, %v1201_v54 }
 0x2ef   :  { %1476 = vmax.xlane.f32.xlu1 %v3577_v24 }
 0x2f0   :  { %v2729_v29 = vpop.f32.mrb[48].mxu0  ;;  %1478 = vmax.xlane.f32.xlu0 %v3580_v26 }
 0x2f1   :  { %v1211_v48 = vpop.f32.mrb[49].mxu0  ;;  %v3593_v53 = vadd.f32 %v2729_v29, %v3522_v41 }
 0x2f2   :  { %v3588_v33 = vadd.f32 %v3522_v41, %v1211_v48 }
 0x2f3   :  { %1480 = vmax.xlane.f32.xlu1 %v3585_v31 }
 0x2f4   :  { %v2732_v34 = vpop.f32.mrb[50].mxu0  ;;  %1482 = vmax.xlane.f32.xlu0 %v3588_v33 }
 0x2f5   :  { %v1221_v9 = vpop.f32.mrb[51].mxu0  ;;  %v3601_v17 = vadd.f32 %v2732_v34, %v3522_v41 }
 0x2f6   :  { %v3596_v3 = vadd.f32 %v3522_v41, %v1221_v9 }
 0x2f7   :  { %1484 = vmax.xlane.f32.xlu1 %v3593_v53 }
 0x2f8   :  { %v2735_v22 = vpop.f32.mrb[52].mxu0  ;;  %1486 = vmax.xlane.f32.xlu0 %v3596_v3 }
 0x2f9   :  { %v1231_v35 = vpop.f32.mrb[53].mxu0  ;;  %v3609_v43 = vadd.f32 %v2735_v22, %v3522_v41 }
 0x2fa   :  { %v3604_v30 = vadd.f32 %v3522_v41, %v1231_v35 }
 0x2fb   :  { %1488 = vmax.xlane.f32.xlu1 %v3601_v17 }
 0x2fc   :  { %v2738_v49 = vpop.f32.mrb[54].mxu0  ;;  %1490 = vmax.xlane.f32.xlu0 %v3604_v30 }
 0x2fd   :  { %v1241_v0 = vpop.f32.mrb[55].mxu0  ;;  %v3617_v10 = vadd.f32 %v2738_v49, %v3522_v41 }
 0x2fe   :  { %v3612_v59 = vadd.f32 %v3522_v41, %v1241_v0 }
 0x2ff   :  { %1492 = vmax.xlane.f32.xlu1 %v3609_v43 }
 0x300   :  { %v2741_v15 = vpop.f32.mrb[56].mxu0  ;;  %1494 = vmax.xlane.f32.xlu0 %v3612_v59 }
 0x301   :  { %v1251_v28 = vpop.f32.mrb[57].mxu0  ;;  %v3625_v37 = vadd.f32 %v2741_v15, %v3522_v41 }
 0x302   :  { %v3620_v25 = vadd.f32 %v3522_v41, %v1251_v28 }
 0x303   :  { %1496 = vmax.xlane.f32.xlu1 %v3617_v10 }
 0x304   :  { %v2744_v40 = vpop.f32.mrb[58].mxu0  ;;  %1498 = vmax.xlane.f32.xlu0 %v3620_v25 }
 0x305   :  { %v1261_v55 = vpop.f32.mrb[59].mxu0  ;;  %v3633_v63 = vadd.f32 %v2744_v40, %v3522_v41 }
 0x306   :  { %v3628_v50 = vadd.f32 %v3522_v41, %v1261_v55 }
 0x307   :  { %1500 = vmax.xlane.f32.xlu1 %v3625_v37 }
 0x308   :  { %v2747_v4 = vpop.f32.mrb[60].mxu0  ;;  %1502 = vmax.xlane.f32.xlu0 %v3628_v50 }
 0x309   :  { %v1271_v18 = vpop.f32.mrb[61].mxu0  ;;  %v3641_v36 = vadd.f32 %v2747_v4, %v3522_v41 }
 0x30a   :  { %v3636_v13 = vadd.f32 %v3522_v41, %v1271_v18 }
 0x30b   :  { %1504 = vmax.xlane.f32.xlu1 %v3633_v63 }
 0x30c   :  { %v2750_v32 = vpop.f32.mrb[62].mxu0  ;;  %1506 = vmax.xlane.f32.xlu0 %v3636_v13 }
 0x30d   :  { %v1281_v38 = vpop.f32.mrb[63].mxu0  ;;  %v3649_v45 = vadd.f32 %v2750_v32, %v3522_v41 }
 0x30e   :  { %v3644_v39 = vadd.f32 %v3522_v41, %v1281_v38 }
 0x30f   :  { %1508 = vmax.xlane.f32.xlu1 %v3641_v36 }
 0x310   :  { %v2753_v42 = vpop.f32.mrb[64].mxu0  ;;  %1510 = vmax.xlane.f32.xlu0 %v3644_v39 }
 0x311   :  { %v1291_v46 = vpop.f32.mrb[65].mxu0  ;;  %v3657_v57 = vadd.f32 %v2753_v42, %v3522_v41 }
 0x312   :  { %v3652_v51 = vadd.f32 %v3522_v41, %v1291_v46 }
 0x313   :  { %1512 = vmax.xlane.f32.xlu1 %v3649_v45 }
 0x314   :  { %v2756_v52 = vpop.f32.mrb[66].mxu0  ;;  %1514 = vmax.xlane.f32.xlu0 %v3652_v51 }
 0x315   :  { %v1301_v60 = vpop.f32.mrb[67].mxu0  ;;  %v3665_v6 = vadd.f32 %v2756_v52, %v3522_v41 }
 0x316   :  { %v3660_v62 = vadd.f32 %v3522_v41, %v1301_v60 }
 0x317   :  { %1516 = vmax.xlane.f32.xlu1 %v3657_v57 }
 0x318   :  { %v2759_v2 = vpop.f32.mrb[68].mxu0  ;;  %1518 = vmax.xlane.f32.xlu0 %v3660_v62 }
 0x319   :  { %v1311_v8 = vpop.f32.mrb[69].mxu0  ;;  %v3673_v20 = vadd.f32 %v2759_v2, %v3522_v41 }
 0x31a   :  { %v3668_v12 = vadd.f32 %v3522_v41, %v1311_v8 }
 0x31b   :  { %1520 = vmax.xlane.f32.xlu1 %v3665_v6 }
 0x31c   :  { %v2762_v16 = vpop.f32.mrb[70].mxu0  ;;  %1522 = vmax.xlane.f32.xlu0 %v3668_v12 }
 0x31d   :  { %v1321_v23 = vpop.f32.mrb[71].mxu0  ;;  %v3681_v48 = vadd.f32 %v2762_v16, %v3522_v41 }
 0x31e   :  { %v3676_v54 = vadd.f32 %v3522_v41, %v1321_v23 }
 0x31f   :  { %1524 = vmax.xlane.f32.xlu1 %v3673_v20 }
 0x320   :  { %v2765_v29 = vpop.f32.mrb[72].mxu0  ;;  %1526 = vmax.xlane.f32.xlu0 %v3676_v54 }
 0x321   :  { %v1331_v34 = vpop.f32.mrb[73].mxu0  ;;  %v3689_v35 = vadd.f32 %v2765_v29, %v3522_v41 }
 0x322   :  { %v3684_v9 = vadd.f32 %v3522_v41, %v1331_v34 }
 0x323   :  { %1528 = vmax.xlane.f32.xlu1 %v3681_v48 }
 0x324   :  { %v2768_v22 = vpop.f32.mrb[74].mxu0  ;;  %1530 = vmax.xlane.f32.xlu0 %v3684_v9 }
 0x325   :  { %v1341_v49 = vpop.f32.mrb[75].mxu0  ;;  %v3697_v28 = vadd.f32 %v2768_v22, %v3522_v41 }
 0x326   :  { %v3692_v0 = vadd.f32 %v3522_v41, %v1341_v49 }
 0x327   :  { %1532 = vmax.xlane.f32.xlu1 %v3689_v35 }
 0x328   :  { %v2771_v15 = vpop.f32.mrb[76].mxu0  ;;  %1534 = vmax.xlane.f32.xlu0 %v3692_v0 }
 0x329   :  { %v1351_v40 = vpop.f32.mrb[77].mxu0  ;;  %v3705_v18 = vadd.f32 %v2771_v15, %v3522_v41 }
 0x32a   :  { %v3700_v55 = vadd.f32 %v3522_v41, %v1351_v40 }
 0x32b   :  { %1536 = vmax.xlane.f32.xlu1 %v3697_v28 }
 0x32c   :  { %v2774_v4 = vpop.f32.mrb[78].mxu0  ;;  %1538 = vmax.xlane.f32.xlu0 %v3700_v55 }
 0x32d   :  { %v1361_v32 = vpop.f32.mrb[79].mxu0  ;;  %v3713_v46 = vadd.f32 %v2774_v4, %v3522_v41 }
 0x32e   :  { %v3708_v38 = vadd.f32 %v3522_v41, %v1361_v32 }
 0x32f   :  { %1540 = vmax.xlane.f32.xlu1 %v3705_v18 }
 0x330   :  { %v2777_v42 = vpop.f32.mrb[80].mxu0  ;;  %1542 = vmax.xlane.f32.xlu0 %v3708_v38 }
 0x331   :  { %v1371_v52 = vpop.f32.mrb[81].mxu0  ;;  %v3721_v8 = vadd.f32 %v2777_v42, %v3522_v41 }
 0x332   :  { %v3716_v60 = vadd.f32 %v3522_v41, %v1371_v52 }
 0x333   :  { %1544 = vmax.xlane.f32.xlu1 %v3713_v46 }
 0x334   :  { %v2780_v2 = vpop.f32.mrb[82].mxu0  ;;  %1546 = vmax.xlane.f32.xlu0 %v3716_v60 }
 0x335   :  { %v1381_v16 = vpop.f32.mrb[83].mxu0  ;;  %v3729_v34 = vadd.f32 %v2780_v2, %v3522_v41 }
 0x336   :  { %v3724_v23 = vadd.f32 %v3522_v41, %v1381_v16 }
 0x337   :  { %1548 = vmax.xlane.f32.xlu1 %v3721_v8 }
 0x338   :  { %v2783_v29 = vpop.f32.mrb[84].mxu0  ;;  %1550 = vmax.xlane.f32.xlu0 %v3724_v23 }
 0x339   :  { %v1391_v22 = vpop.f32.mrb[85].mxu0  ;;  %v3737_v40 = vadd.f32 %v2783_v29, %v3522_v41 }
 0x33a   :  { %v3732_v49 = vadd.f32 %v3522_v41, %v1391_v22 }
 0x33b   :  { %1552 = vmax.xlane.f32.xlu1 %v3729_v34  ;;  %4143 = vst [vmem:[#allocation11_spill] sm:$0xff] %v3737_v40 }
 0x33c   :  { %v2786_v15 = vpop.f32.mrb[86].mxu0  ;;  %1554 = vmax.xlane.f32.xlu0 %v3732_v49 }
 0x33d   :  { %v1401_v4 = vpop.f32.mrb[87].mxu0  ;;  %v3745_v52 = vadd.f32 %v2786_v15, %v3522_v41 }
 0x33e   :  { %v3740_v32 = vadd.f32 %v3522_v41, %v1401_v4 }
 0x33f   :  { %1556 = vmax.xlane.f32.xlu1 %v3737_v40  ;;  %4145 = vst [vmem:[#allocation13_spill] sm:$0xff] %v3745_v52 }
 0x340   :  { %4144 = vst [vmem:[#allocation12_spill] sm:$0xff] %v3740_v32  ;;  %v2789_v42 = vpop.f32.mrb[88].mxu0  ;;  %1558 = vmax.xlane.f32.xlu0 %v3740_v32 }
 0x341   :  { %v1411_v2 = vpop.f32.mrb[89].mxu0  ;;  %v3753_v22 = vadd.f32 %v2789_v42, %v3522_v41 }
 0x342   :  { %v3748_v16 = vadd.f32 %v3522_v41, %v1411_v2 }
 0x343   :  { %1560 = vmax.xlane.f32.xlu1 %v3745_v52  ;;  %4147 = vst [vmem:[#allocation15_spill] sm:$0xff] %v3753_v22 }
 0x344   :  { %4146 = vst [vmem:[#allocation14_spill] sm:$0xff] %v3748_v16  ;;  %v2792_v29 = vpop.f32.mrb[90].mxu0  ;;  %1562 = vmax.xlane.f32.xlu0 %v3748_v16 }
 0x345   :  { %v1421_v4 = vpop.f32.mrb[91].mxu0  ;;  %v3761_v2 = vadd.f32 %v2792_v29, %v3522_v41 }
 0x346   :  { %v3756_v40 = vadd.f32 %v3522_v41, %v1421_v4 }
 0x347   :  { %1564 = vmax.xlane.f32.xlu1 %v3753_v22  ;;  %4149 = vst [vmem:[#allocation17_spill] sm:$0xff] %v3761_v2 }
 0x348   :  { %4148 = vst [vmem:[#allocation16_spill] sm:$0xff] %v3756_v40  ;;  %v2795_v15 = vpop.f32.mrb[92].mxu0  ;;  %1566 = vmax.xlane.f32.xlu0 %v3756_v40 }
 0x349   :  { %v1431_v32 = vpop.f32.mrb[93].mxu0  ;;  %v3769_v4 = vadd.f32 %v2795_v15, %v3522_v41 }
 0x34a   :  { %v3764_v52 = vadd.f32 %v3522_v41, %v1431_v32 }
 0x34b   :  { %1568 = vmax.xlane.f32.xlu1 %v3761_v2  ;;  %4151 = vst [vmem:[#allocation19_spill] sm:$0xff] %v3769_v4 }
 0x34c   :  { %4150 = vst [vmem:[#allocation18_spill] sm:$0xff] %v3764_v52  ;;  %v2798_v42 = vpop.f32.mrb[94].mxu0  ;;  %1570 = vmax.xlane.f32.xlu0 %v3764_v52 }
 0x34d   :  { %v1441_v16 = vpop.f32.mrb[95].mxu0  ;;  %v3777_v29 = vadd.f32 %v2798_v42, %v3522_v41 }
 0x34e   :  { %v3772_v22 = vadd.f32 %v3522_v41, %v1441_v16 }
 0x34f   :  { %1572 = vmax.xlane.f32.xlu1 %v3769_v4  ;;  %4152 = vst [vmem:[#allocation20_spill] sm:$0xff] %v3777_v29 }
 0x350   :  { %1574 = vmax.xlane.f32.xlu0 %v3772_v22 }
 0x353   :  { %1576 = vmax.xlane.f32.xlu1 %v3777_v29 }
 0x360   :  { %v1453_v32 = vpop.xlane.xlu0 %1452 }
 0x361   :  { %v3781_v2 = vsub.f32 %v3525_v44, %v1453_v32 }
 0x363   :  { %4153 = vst [vmem:[#allocation21_spill] sm:$0xff] %v3781_v2  ;;  %v1644_v15 = vmul.f32 1.442695, %v3781_v2 }
 0x364   :  { %v1457_v52 = vpop.xlane.xlu1 %1456  ;;  %v1451_v40 = vpop.xlane.xlu0 %1450 }
 0x365   :  { %2916 = vpow2.f32 %v1644_v15  ;;  %v3785_v16 = vsub.f32 %v3532_v27, %v1457_v52  ;;  %v3788_v4 = vsub.f32 %v3529_v47, %v1451_v40 }
 0x367   :  { %v1648_v41 = vmul.f32 1.442695, %v3785_v16  ;;  %v1642_v42 = vmul.f32 1.442695, %v3788_v4 }
 0x368   :  { %v1455_v29 = vpop.xlane.xlu1 %1454 }
 0x369   :  { %2918 = vpow2.f32 %v1648_v41  ;;  %v3793_v44 = vsub.f32 %v3537_v56, %v1455_v29  ;;  %v1459_v32 = vpop.xlane.xlu0 %1458 }
 0x36a   :  { %2920 = vpow2.f32 %v1642_v42  ;;  %v3796_v2 = vsub.f32 %v3540_v58, %v1459_v32 }
 0x36b   :  { %v1646_v27 = vmul.f32 1.442695, %v3793_v44 }
 0x36c   :  { %4154 = vst [vmem:[#allocation22_spill] sm:$0xff] %v3796_v2  ;;  %v1461_v52 = vpop.xlane.xlu1 %1460  ;;  %v1650_v15 = vmul.f32 1.442695, %v3796_v2 }
 0x36d   :  { %2922 = vpow2.f32 %v1646_v27  ;;  %v3800_v47 = vsub.f32 %v3545_v61, %v1461_v52  ;;  %v1463_v40 = vpop.xlane.xlu0 %1462 }
 0x36e   :  { %v3804_v41 = vsub.f32 %v3548_v1, %v1463_v40 }
 0x36f   :  { %v2917_v56 = vpop.eup %2916  ;;  %v1652_v29 = vmul.f32 1.442695, %v3800_v47 }
 0x370   :  { %1772 = vadd.xlane.f32.xlu1 %v2917_v56  ;;  %v1465_v42 = vpop.xlane.xlu1 %1464  ;;  %v1654_v61 = vmul.f32 1.442695, %v3804_v41 }
 0x371   :  { %2924 = vpow2.f32 %v1652_v29  ;;  %v3808_v58 = vsub.f32 %v3553_v5, %v1465_v42  ;;  %v1467_v32 = vpop.xlane.xlu0 %1466 }
 0x372   :  { %2926 = vpow2.f32 %v1650_v15  ;;  %v3812_v27 = vsub.f32 %v3556_v7, %v1467_v32 }
 0x373   :  { %v2919_v52 = vpop.eup %2918  ;;  %v1656_v1 = vmul.f32 1.442695, %v3808_v58 }
 0x374   :  { %v2921_v40 = vpop.eup %2920  ;;  %1776 = vadd.xlane.f32.xlu1 %v2919_v52  ;;  %v1469_v2 = vpop.xlane.xlu1 %1468  ;;  %v1658_v15 = vmul.f32 1.442695, %v3812_v27 }
 0x375   :  { %2928 = vpow2.f32 %v1656_v1  ;;  %v3816_v56 = vsub.f32 %v3561_v11, %v1469_v2  ;;  %1770 = vadd.xlane.f32.xlu0 %v2921_v40  ;;  %v1471_v5 = vpop.xlane.xlu0 %1470 }
 0x376   :  { %2930 = vpow2.f32 %v1654_v61  ;;  %v3820_v29 = vsub.f32 %v3564_v14, %v1471_v5 }
 0x377   :  { %v2923_v7 = vpop.eup %2922  ;;  %v1660_v42 = vmul.f32 1.442695, %v3816_v56 }
 0x378   :  { %4155 = vst [vmem:[#allocation23_spill] sm:$0xff] %v3820_v29  ;;  %v1473_v32 = vpop.xlane.xlu1 %1472  ;;  %v1662_v11 = vmul.f32 1.442695, %v3820_v29 }
 0x379   :  { %2932 = vpow2.f32 %v1660_v42  ;;  %v3824_v52 = vsub.f32 %v3569_v19, %v1473_v32  ;;  %1774 = vadd.xlane.f32.xlu0 %v2923_v7  ;;  %v1475_v1 = vpop.xlane.xlu0 %1474 }
 0x37a   :  { %2934 = vpow2.f32 %v1658_v15  ;;  %v3828_v2 = vsub.f32 %v3572_v21, %v1475_v1 }
 0x37b   :  { %v2925_v61 = vpop.eup %2924  ;;  %v1664_v14 = vmul.f32 1.442695, %v3824_v52 }
 0x37c   :  { %v2927_v40 = vpop.eup %2926  ;;  %1780 = vadd.xlane.f32.xlu1 %v2925_v61  ;;  %v1477_v5 = vpop.xlane.xlu1 %1476  ;;  %v1666_v15 = vmul.f32 1.442695, %v3828_v2 }
 0x37d   :  { %2936 = vpow2.f32 %v1664_v14  ;;  %v3832_v42 = vsub.f32 %v3577_v24, %v1477_v5  ;;  %1778 = vadd.xlane.f32.xlu0 %v2927_v40  ;;  %v1479_v19 = vpop.xlane.xlu0 %1478 }
 0x37e   :  { %2938 = vpow2.f32 %v1662_v11  ;;  %v3836_v7 = vsub.f32 %v3580_v26, %v1479_v19 }
 0x37f   :  { %v2929_v21 = vpop.eup %2928  ;;  %v1668_v32 = vmul.f32 1.442695, %v3832_v42 }
 0x380   :  { %v2931_v1 = vpop.eup %2930  ;;  %1784 = vadd.xlane.f32.xlu1 %v2929_v21  ;;  %v1481_v29 = vpop.xlane.xlu1 %1480  ;;  %v1670_v11 = vmul.f32 1.442695, %v3836_v7 }
 0x381   :  { %2940 = vpow2.f32 %v1668_v32  ;;  %v3840_v61 = vsub.f32 %v3585_v31, %v1481_v29  ;;  %1782 = vadd.xlane.f32.xlu0 %v2931_v1  ;;  %v1483_v24 = vpop.xlane.xlu0 %1482 }
 0x382   :  { %2942 = vpow2.f32 %v1666_v15  ;;  %v3844_v14 = vsub.f32 %v3588_v33, %v1483_v24 }
 0x383   :  { %v2933_v26 = vpop.eup %2932  ;;  %v1672_v40 = vmul.f32 1.442695, %v3840_v61 }
 0x384   :  { %v2935_v5 = vpop.eup %2934  ;;  %1788 = vadd.xlane.f32.xlu1 %v2933_v26  ;;  %v1485_v19 = vpop.xlane.xlu1 %1484  ;;  %v1674_v29 = vmul.f32 1.442695, %v3844_v14 }
 0x385   :  { %2944 = vpow2.f32 %v1672_v40  ;;  %v3848_v21 = vsub.f32 %v3593_v53, %v1485_v19  ;;  %1786 = vadd.xlane.f32.xlu0 %v2935_v5  ;;  %v1487_v31 = vpop.xlane.xlu0 %1486 }
 0x386   :  { %2946 = vpow2.f32 %v1670_v11  ;;  %v3852_v15 = vsub.f32 %v3596_v3, %v1487_v31 }
 0x387   :  { %v2937_v33 = vpop.eup %2936  ;;  %v1676_v32 = vmul.f32 1.442695, %v3848_v21 }
 0x388   :  { %v2939_v1 = vpop.eup %2938  ;;  %1792 = vadd.xlane.f32.xlu1 %v2937_v33  ;;  %v1489_v24 = vpop.xlane.xlu1 %1488  ;;  %v1678_v11 = vmul.f32 1.442695, %v3852_v15 }
 0x389   :  { %2948 = vpow2.f32 %v1676_v32  ;;  %v3856_v26 = vsub.f32 %v3601_v17, %v1489_v24  ;;  %1790 = vadd.xlane.f32.xlu0 %v2939_v1  ;;  %v1491_v53 = vpop.xlane.xlu0 %1490 }
 0x38a   :  { %2950 = vpow2.f32 %v1674_v29  ;;  %v3860_v40 = vsub.f32 %v3604_v30, %v1491_v53 }
 0x38b   :  { %v2941_v3 = vpop.eup %2940  ;;  %v1680_v5 = vmul.f32 1.442695, %v3856_v26 }
 0x38c   :  { %v2943_v19 = vpop.eup %2942  ;;  %1796 = vadd.xlane.f32.xlu1 %v2941_v3  ;;  %v1493_v31 = vpop.xlane.xlu1 %1492  ;;  %v1682_v29 = vmul.f32 1.442695, %v3860_v40 }
 0x38d   :  { %2952 = vpow2.f32 %v1680_v5  ;;  %v3864_v33 = vsub.f32 %v3609_v43, %v1493_v31  ;;  %1794 = vadd.xlane.f32.xlu0 %v2943_v19  ;;  %v1495_v17 = vpop.xlane.xlu0 %1494 }
 0x38e   :  { %2954 = vpow2.f32 %v1678_v11  ;;  %v3868_v32 = vsub.f32 %v3612_v59, %v1495_v17 }
 0x38f   :  { %v2945_v30 = vpop.eup %2944  ;;  %v1684_v1 = vmul.f32 1.442695, %v3864_v33 }
 0x390   :  { %v2947_v24 = vpop.eup %2946  ;;  %1800 = vadd.xlane.f32.xlu1 %v2945_v30  ;;  %v1497_v53 = vpop.xlane.xlu1 %1496  ;;  %v1686_v11 = vmul.f32 1.442695, %v3868_v32 }
 0x391   :  { %2956 = vpow2.f32 %v1684_v1  ;;  %v3872_v3 = vsub.f32 %v3617_v10, %v1497_v53  ;;  %1798 = vadd.xlane.f32.xlu0 %v2947_v24  ;;  %v1499_v43 = vpop.xlane.xlu0 %1498 }
 0x392   :  { %2958 = vpow2.f32 %v1682_v29  ;;  %v3876_v5 = vsub.f32 %v3620_v25, %v1499_v43 }
 0x393   :  { %v2949_v59 = vpop.eup %2948  ;;  %v1688_v19 = vmul.f32 1.442695, %v3872_v3 }
 0x394   :  { %v2951_v31 = vpop.eup %2950  ;;  %1804 = vadd.xlane.f32.xlu1 %v2949_v59  ;;  %v1501_v17 = vpop.xlane.xlu1 %1500  ;;  %v1690_v29 = vmul.f32 1.442695, %v3876_v5 }
 0x395   :  { %2960 = vpow2.f32 %v1688_v19  ;;  %v3880_v30 = vsub.f32 %v3625_v37, %v1501_v17  ;;  %1802 = vadd.xlane.f32.xlu0 %v2951_v31  ;;  %v1503_v10 = vpop.xlane.xlu0 %1502 }
 0x396   :  { %2962 = vpow2.f32 %v1686_v11  ;;  %v3884_v1 = vsub.f32 %v3628_v50, %v1503_v10 }
 0x397   :  { %v2953_v25 = vpop.eup %2952  ;;  %v1692_v24 = vmul.f32 1.442695, %v3880_v30 }
 0x398   :  { %v2955_v53 = vpop.eup %2954  ;;  %1808 = vadd.xlane.f32.xlu1 %v2953_v25  ;;  %v1505_v43 = vpop.xlane.xlu1 %1504  ;;  %v1694_v11 = vmul.f32 1.442695, %v3884_v1 }
 0x399   :  { %2964 = vpow2.f32 %v1692_v24  ;;  %v3888_v59 = vsub.f32 %v3633_v63, %v1505_v43  ;;  %1806 = vadd.xlane.f32.xlu0 %v2955_v53  ;;  %v1507_v37 = vpop.xlane.xlu0 %1506 }
 0x39a   :  { %2966 = vpow2.f32 %v1690_v29  ;;  %v3892_v19 = vsub.f32 %v3636_v13, %v1507_v37 }
 0x39b   :  { %v2957_v50 = vpop.eup %2956  ;;  %v1696_v31 = vmul.f32 1.442695, %v3888_v59 }
 0x39c   :  { %v2959_v17 = vpop.eup %2958  ;;  %1812 = vadd.xlane.f32.xlu1 %v2957_v50  ;;  %v1509_v10 = vpop.xlane.xlu1 %1508  ;;  %v1698_v29 = vmul.f32 1.442695, %v3892_v19 }
 0x39d   :  { %2968 = vpow2.f32 %v1696_v31  ;;  %v3896_v25 = vsub.f32 %v3641_v36, %v1509_v10  ;;  %1810 = vadd.xlane.f32.xlu0 %v2959_v17  ;;  %v1511_v63 = vpop.xlane.xlu0 %1510 }
 0x39e   :  { %2970 = vpow2.f32 %v1694_v11  ;;  %v3900_v24 = vsub.f32 %v3644_v39, %v1511_v63 }
 0x39f   :  { %v2961_v13 = vpop.eup %2960  ;;  %v1700_v53 = vmul.f32 1.442695, %v3896_v25 }
 0x3a0   :  { %v2963_v43 = vpop.eup %2962  ;;  %1816 = vadd.xlane.f32.xlu1 %v2961_v13  ;;  %v1513_v37 = vpop.xlane.xlu1 %1512  ;;  %v1702_v11 = vmul.f32 1.442695, %v3900_v24 }
 0x3a1   :  { %2972 = vpow2.f32 %v1700_v53  ;;  %v3904_v50 = vsub.f32 %v3649_v45, %v1513_v37  ;;  %1814 = vadd.xlane.f32.xlu0 %v2963_v43  ;;  %v1515_v36 = vpop.xlane.xlu0 %1514 }
 0x3a2   :  { %2974 = vpow2.f32 %v1698_v29  ;;  %v3908_v31 = vsub.f32 %v3652_v51, %v1515_v36 }
 0x3a3   :  { %v2965_v39 = vpop.eup %2964  ;;  %v1704_v17 = vmul.f32 1.442695, %v3904_v50 }
 0x3a4   :  { %v2967_v10 = vpop.eup %2966  ;;  %1820 = vadd.xlane.f32.xlu1 %v2965_v39  ;;  %v1517_v63 = vpop.xlane.xlu1 %1516  ;;  %v1706_v29 = vmul.f32 1.442695, %v3908_v31 }
 0x3a5   :  { %2976 = vpow2.f32 %v1704_v17  ;;  %v3912_v13 = vsub.f32 %v3657_v57, %v1517_v63  ;;  %1818 = vadd.xlane.f32.xlu0 %v2967_v10  ;;  %v1519_v45 = vpop.xlane.xlu0 %1518 }
 0x3a6   :  { %2978 = vpow2.f32 %v1702_v11  ;;  %v3916_v53 = vsub.f32 %v3660_v62, %v1519_v45 }
 0x3a7   :  { %v2969_v51 = vpop.eup %2968  ;;  %v1708_v43 = vmul.f32 1.442695, %v3912_v13 }
 0x3a8   :  { %v2971_v37 = vpop.eup %2970  ;;  %1824 = vadd.xlane.f32.xlu1 %v2969_v51  ;;  %v1521_v36 = vpop.xlane.xlu1 %1520  ;;  %v1710_v11 = vmul.f32 1.442695, %v3916_v53 }
 0x3a9   :  { %2980 = vpow2.f32 %v1708_v43  ;;  %v3920_v39 = vsub.f32 %v3665_v6, %v1521_v36  ;;  %1822 = vadd.xlane.f32.xlu0 %v2971_v37  ;;  %v1523_v57 = vpop.xlane.xlu0 %1522 }
 0x3aa   :  { %2982 = vpow2.f32 %v1706_v29  ;;  %v3924_v17 = vsub.f32 %v3668_v12, %v1523_v57 }
 0x3ab   :  { %v2973_v62 = vpop.eup %2972  ;;  %v1712_v10 = vmul.f32 1.442695, %v3920_v39 }
 0x3ac   :  { %v2975_v63 = vpop.eup %2974  ;;  %1828 = vadd.xlane.f32.xlu1 %v2973_v62  ;;  %v1525_v45 = vpop.xlane.xlu1 %1524  ;;  %v1714_v29 = vmul.f32 1.442695, %v3924_v17 }
 0x3ad   :  { %2984 = vpow2.f32 %v1712_v10  ;;  %v3928_v51 = vsub.f32 %v3673_v20, %v1525_v45  ;;  %1826 = vadd.xlane.f32.xlu0 %v2975_v63  ;;  %v1527_v6 = vpop.xlane.xlu0 %1526 }
 0x3ae   :  { %2986 = vpow2.f32 %v1710_v11  ;;  %v3932_v43 = vsub.f32 %v3676_v54, %v1527_v6 }
 0x3af   :  { %v2977_v12 = vpop.eup %2976  ;;  %v1716_v37 = vmul.f32 1.442695, %v3928_v51 }
 0x3b0   :  { %v2979_v36 = vpop.eup %2978  ;;  %1832 = vadd.xlane.f32.xlu1 %v2977_v12  ;;  %v1529_v57 = vpop.xlane.xlu1 %1528  ;;  %v1718_v11 = vmul.f32 1.442695, %v3932_v43 }
 0x3b1   :  { %2988 = vpow2.f32 %v1716_v37  ;;  %v3936_v62 = vsub.f32 %v3681_v48, %v1529_v57  ;;  %1830 = vadd.xlane.f32.xlu0 %v2979_v36  ;;  %v1531_v20 = vpop.xlane.xlu0 %1530 }
 0x3b2   :  { %2990 = vpow2.f32 %v1714_v29  ;;  %v3940_v10 = vsub.f32 %v3684_v9, %v1531_v20 }
 0x3b3   :  { %v2981_v54 = vpop.eup %2980  ;;  %v1720_v63 = vmul.f32 1.442695, %v3936_v62 }
 0x3b4   :  { %v2983_v45 = vpop.eup %2982  ;;  %1836 = vadd.xlane.f32.xlu1 %v2981_v54  ;;  %v1533_v6 = vpop.xlane.xlu1 %1532  ;;  %v1722_v29 = vmul.f32 1.442695, %v3940_v10 }
 0x3b5   :  { %2992 = vpow2.f32 %v1720_v63  ;;  %v3944_v12 = vsub.f32 %v3689_v35, %v1533_v6  ;;  %1834 = vadd.xlane.f32.xlu0 %v2983_v45  ;;  %v1535_v48 = vpop.xlane.xlu0 %1534 }
 0x3b6   :  { %2994 = vpow2.f32 %v1718_v11  ;;  %v3948_v37 = vsub.f32 %v3692_v0, %v1535_v48 }
 0x3b7   :  { %v2985_v9 = vpop.eup %2984  ;;  %v1724_v36 = vmul.f32 1.442695, %v3944_v12 }
 0x3b8   :  { %v2987_v57 = vpop.eup %2986  ;;  %1840 = vadd.xlane.f32.xlu1 %v2985_v9  ;;  %v1537_v20 = vpop.xlane.xlu1 %1536  ;;  %v1726_v11 = vmul.f32 1.442695, %v3948_v37 }
 0x3b9   :  { %2996 = vpow2.f32 %v1724_v36  ;;  %v3952_v54 = vsub.f32 %v3697_v28, %v1537_v20  ;;  %1838 = vadd.xlane.f32.xlu0 %v2987_v57  ;;  %v1539_v35 = vpop.xlane.xlu0 %1538 }
 0x3ba   :  { %2998 = vpow2.f32 %v1722_v29  ;;  %v3956_v63 = vsub.f32 %v3700_v55, %v1539_v35 }
 0x3bb   :  { %v2989_v0 = vpop.eup %2988  ;;  %v1728_v45 = vmul.f32 1.442695, %v3952_v54 }
 0x3bc   :  { %v2991_v6 = vpop.eup %2990  ;;  %1844 = vadd.xlane.f32.xlu1 %v2989_v0  ;;  %v1541_v48 = vpop.xlane.xlu1 %1540  ;;  %v1730_v29 = vmul.f32 1.442695, %v3956_v63 }
 0x3bd   :  { %3000 = vpow2.f32 %v1728_v45  ;;  %v3960_v9 = vsub.f32 %v3705_v18, %v1541_v48  ;;  %1842 = vadd.xlane.f32.xlu0 %v2991_v6  ;;  %v1543_v28 = vpop.xlane.xlu0 %1542 }
 0x3be   :  { %3002 = vpow2.f32 %v1726_v11  ;;  %v3964_v36 = vsub.f32 %v3708_v38, %v1543_v28 }
 0x3bf   :  { %v2993_v55 = vpop.eup %2992  ;;  %v1732_v57 = vmul.f32 1.442695, %v3960_v9 }
 0x3c0   :  { %v2995_v20 = vpop.eup %2994  ;;  %1848 = vadd.xlane.f32.xlu1 %v2993_v55  ;;  %v1545_v35 = vpop.xlane.xlu1 %1544  ;;  %v1734_v11 = vmul.f32 1.442695, %v3964_v36 }
 0x3c1   :  { %3004 = vpow2.f32 %v1732_v57  ;;  %v3968_v0 = vsub.f32 %v3713_v46, %v1545_v35  ;;  %1846 = vadd.xlane.f32.xlu0 %v2995_v20  ;;  %v1547_v18 = vpop.xlane.xlu0 %1546 }
 0x3c2   :  { %3006 = vpow2.f32 %v1730_v29  ;;  %v3972_v45 = vsub.f32 %v3716_v60, %v1547_v18 }
 0x3c3   :  { %v2997_v38 = vpop.eup %2996  ;;  %v1736_v6 = vmul.f32 1.442695, %v3968_v0 }
 0x3c4   :  { %v2999_v48 = vpop.eup %2998  ;;  %1852 = vadd.xlane.f32.xlu1 %v2997_v38  ;;  %v1549_v28 = vpop.xlane.xlu1 %1548  ;;  %v1738_v29 = vmul.f32 1.442695, %v3972_v45 }
 0x3c5   :  { %3008 = vpow2.f32 %v1736_v6  ;;  %v3976_v55 = vsub.f32 %v3721_v8, %v1549_v28  ;;  %1850 = vadd.xlane.f32.xlu0 %v2999_v48  ;;  %v1551_v46 = vpop.xlane.xlu0 %1550 }
 0x3c6   :  { %3010 = vpow2.f32 %v1734_v11  ;;  %v3980_v57 = vsub.f32 %v3724_v23, %v1551_v46 }
 0x3c7   :  { %v3001_v60 = vpop.eup %3000  ;;  %v1740_v20 = vmul.f32 1.442695, %v3976_v55 }
 0x3c8   :  { %4156 = vst [vmem:[#allocation24_spill] sm:$0xff] %v3980_v57  ;;  %v3003_v35 = vpop.eup %3002  ;;  %1856 = vadd.xlane.f32.xlu1 %v3001_v60  ;;  %v1553_v18 = vpop.xlane.xlu1 %1552  ;;  %v1742_v11 = vmul.f32 1.442695, %v3980_v57  ;;  %v4159_v60 = vld [vmem:[#allocation11_spill] sm:$0xff] }
 0x3c9   :  { %3012 = vpow2.f32 %v1740_v20  ;;  %v3984_v38 = vsub.f32 %v3729_v34, %v1553_v18  ;;  %1854 = vadd.xlane.f32.xlu0 %v3003_v35  ;;  %v1555_v8 = vpop.xlane.xlu0 %1554  ;;  %v4161_v35 = vld [vmem:[#allocation12_spill] sm:$0xff] }
 0x3ca   :  { %3014 = vpow2.f32 %v1738_v29  ;;  %v3988_v6 = vsub.f32 %v3732_v49, %v1555_v8 }
 0x3cb   :  { %4157 = vst [vmem:[#allocation25_spill] sm:$0xff] %v3984_v38  ;;  %v3005_v23 = vpop.eup %3004  ;;  %v1744_v48 = vmul.f32 1.442695, %v3984_v38 }
 0x3cc   :  { %4158 = vst [vmem:[#allocation26_spill] sm:$0xff] %v3988_v6  ;;  %v3007_v28 = vpop.eup %3006  ;;  %1860 = vadd.xlane.f32.xlu1 %v3005_v23  ;;  %v1557_v46 = vpop.xlane.xlu1 %1556  ;;  %v1746_v29 = vmul.f32 1.442695, %v3988_v6  ;;  %v4163_v23 = vld [vmem:[#allocation13_spill] sm:$0xff] }
 0x3cd   :  { %3016 = vpow2.f32 %v1744_v48  ;;  %v3992_v20 = vsub.f32 %v4159_v60, %v1557_v46  ;;  %1858 = vadd.xlane.f32.xlu0 %v3007_v28  ;;  %v1559_v34 = vpop.xlane.xlu0 %1558  ;;  %v4165_v28 = vld [vmem:[#allocation14_spill] sm:$0xff] }
 0x3ce   :  { %3018 = vpow2.f32 %v1742_v11  ;;  %v3996_v18 = vsub.f32 %v4161_v35, %v1559_v34 }
 0x3cf   :  { %4160 = vst [vmem:[#allocation11_spill] sm:$0xff] %v3992_v20  ;;  %v3009_v49 = vpop.eup %3008  ;;  %v1748_v8 = vmul.f32 1.442695, %v3992_v20 }
 0x3d0   :  { %4162 = vst [vmem:[#allocation12_spill] sm:$0xff] %v3996_v18  ;;  %v3011_v57 = vpop.eup %3010  ;;  %1864 = vadd.xlane.f32.xlu1 %v3009_v49  ;;  %v1561_v38 = vpop.xlane.xlu1 %1560  ;;  %v1750_v11 = vmul.f32 1.442695, %v3996_v18  ;;  %v4167_v49 = vld [vmem:[#allocation15_spill] sm:$0xff] }
 0x3d1   :  { %3020 = vpow2.f32 %v1748_v8  ;;  %v4000_v48 = vsub.f32 %v4163_v23, %v1561_v38  ;;  %1862 = vadd.xlane.f32.xlu0 %v3011_v57  ;;  %v1563_v46 = vpop.xlane.xlu0 %1562 }
 0x3d2   :  { %3022 = vpow2.f32 %v1746_v29  ;;  %v4004_v60 = vsub.f32 %v4165_v28, %v1563_v46  ;;  %v4169_v29 = vld [vmem:[#allocation16_spill] sm:$0xff] }
 0x3d3   :  { %4164 = vst [vmem:[#allocation13_spill] sm:$0xff] %v4000_v48  ;;  %v3013_v34 = vpop.eup %3012  ;;  %v1752_v35 = vmul.f32 1.442695, %v4000_v48 }
 0x3d4   :  { %4166 = vst [vmem:[#allocation14_spill] sm:$0xff] %v4004_v60  ;;  %v3015_v6 = vpop.eup %3014  ;;  %1868 = vadd.xlane.f32.xlu1 %v3013_v34  ;;  %v1565_v20 = vpop.xlane.xlu1 %1564  ;;  %v1754_v57 = vmul.f32 1.442695, %v4004_v60  ;;  %v4171_v34 = vld [vmem:[#allocation17_spill] sm:$0xff] }
 0x3d5   :  { %3024 = vpow2.f32 %v1752_v35  ;;  %v4008_v8 = vsub.f32 %v4167_v49, %v1565_v20  ;;  %1866 = vadd.xlane.f32.xlu0 %v3015_v6  ;;  %v1567_v38 = vpop.xlane.xlu0 %1566 }
 0x3d6   :  { %3026 = vpow2.f32 %v1750_v11  ;;  %v4012_v23 = vsub.f32 %v4169_v29, %v1567_v38  ;;  %v4172_v11 = vld [vmem:[#allocation18_spill] sm:$0xff] }
 0x3d7   :  { %4168 = vst [vmem:[#allocation15_spill] sm:$0xff] %v4008_v8  ;;  %v3017_v46 = vpop.eup %3016  ;;  %v1756_v28 = vmul.f32 1.442695, %v4008_v8 }
 0x3d8   :  { %4170 = vst [vmem:[#allocation16_spill] sm:$0xff] %v4012_v23  ;;  %v3019_v18 = vpop.eup %3018  ;;  %1872 = vadd.xlane.f32.xlu1 %v3017_v46  ;;  %v1569_v48 = vpop.xlane.xlu1 %1568  ;;  %v1758_v6 = vmul.f32 1.442695, %v4012_v23  ;;  %v4174_v46 = vld [vmem:[#allocation19_spill] sm:$0xff] }
 0x3d9   :  { %3028 = vpow2.f32 %v1756_v28  ;;  %v4016_v35 = vsub.f32 %v4171_v34, %v1569_v48  ;;  %1870 = vadd.xlane.f32.xlu0 %v3019_v18  ;;  %v1571_v20 = vpop.xlane.xlu0 %1570 }
 0x3da   :  { %3030 = vpow2.f32 %v1754_v57  ;;  %v4020_v49 = vsub.f32 %v4172_v11, %v1571_v20 }
 0x3db   :  { %v3021_v38 = vpop.eup %3020  ;;  %v1760_v29 = vmul.f32 1.442695, %v4016_v35 }
 0x3dc   :  { %4173 = vst [vmem:[#allocation17_spill] sm:$0xff] %v4020_v49  ;;  %v3023_v60 = vpop.eup %3022  ;;  %1876 = vadd.xlane.f32.xlu1 %v3021_v38  ;;  %v1573_v8 = vpop.xlane.xlu1 %1572  ;;  %v1762_v18 = vmul.f32 1.442695, %v4020_v49  ;;  %v4176_v38 = vld [vmem:[#allocation20_spill] sm:$0xff] }
 0x3dd   :  { %3032 = vpow2.f32 %v1760_v29  ;;  %v4024_v28 = vsub.f32 %v4174_v46, %v1573_v8  ;;  %1874 = vadd.xlane.f32.xlu0 %v3023_v60  ;;  %v1575_v48 = vpop.xlane.xlu0 %1574 }
 0x3de   :  { %3034 = vpow2.f32 %v1758_v6  ;;  %v4028_v57 = vsub.f32 %v3772_v22, %v1575_v48 }
 0x3df   :  { %v3025_v34 = vpop.eup %3024  ;;  %v1764_v20 = vmul.f32 1.442695, %v4024_v28 }
 0x3e0   :  { %4175 = vst [vmem:[#allocation18_spill] sm:$0xff] %v4028_v57  ;;  %v3027_v11 = vpop.eup %3026  ;;  %1880 = vadd.xlane.f32.xlu1 %v3025_v34  ;;  %v1577_v23 = vpop.xlane.xlu1 %1576  ;;  %v1766_v60 = vmul.f32 1.442695, %v4028_v57  ;;  %v4178_v57 = vld [vmem:[#allocation21_spill] sm:$0xff] }
 0x3e1   :  { %3036 = vpow2.f32 %v1764_v20  ;;  %v4032_v29 = vsub.f32 %v4176_v38, %v1577_v23  ;;  %1878 = vadd.xlane.f32.xlu0 %v3027_v11 }
 0x3e2   :  { %3038 = vpow2.f32 %v1762_v18 }
 0x3e3   :  { %4177 = vst [vmem:[#allocation19_spill] sm:$0xff] %v4032_v29  ;;  %v3029_v8 = vpop.eup %3028  ;;  %v1768_v6 = vmul.f32 1.442695, %v4032_v29 }
 0x3e4   :  { %v3031_v46 = vpop.eup %3030  ;;  %1884 = vadd.xlane.f32.xlu1 %v3029_v8 }
 0x3e5   :  { %3040 = vpow2.f32 %v1768_v6  ;;  %1882 = vadd.xlane.f32.xlu0 %v3031_v46 }
 0x3e6   :  { %3042 = vpow2.f32 %v1766_v60 }
 0x3e7   :  { %v3033_v22 = vpop.eup %3032 }
 0x3e8   :  { %v3035_v48 = vpop.eup %3034  ;;  %1888 = vadd.xlane.f32.xlu1 %v3033_v22 }
 0x3e9   :  { %1886 = vadd.xlane.f32.xlu0 %v3035_v48 }
 0x3eb   :  { %v3037_v34 = vpop.eup %3036 }
 0x3ec   :  { %v3039_v20 = vpop.eup %3038  ;;  %1892 = vadd.xlane.f32.xlu1 %v3037_v34 }
 0x3ed   :  { %1890 = vadd.xlane.f32.xlu0 %v3039_v20 }
 0x3ef   :  { %v3041_v23 = vpop.eup %3040 }
 0x3f0   :  { %v3043_v18 = vpop.eup %3042  ;;  %1896 = vadd.xlane.f32.xlu1 %v3041_v23 }
 0x3f1   :  { %1894 = vadd.xlane.f32.xlu0 %v3043_v18 }
 0x3fd   :  { %v1773_v11 = vpop.xlane.xlu1 %1772 }
 0x3fe   :  { %3044 = vlog2.f32 %v1773_v11 }
 0x401   :  { %v1777_v38 = vpop.xlane.xlu1 %1776 }
 0x402   :  { %3046 = vlog2.f32 %v1777_v38  ;;  %v1771_v8 = vpop.xlane.xlu0 %1770 }
 0x403   :  { %3048 = vlog2.f32 %v1771_v8 }
 0x406   :  { %v1775_v6 = vpop.xlane.xlu0 %1774 }
 0x407   :  { %3050 = vlog2.f32 %v1775_v6 }
 0x408   :  { %v3045_v60 = vpop.eup %3044 }
 0x409   :  { %v1901_v46 = vmul.f32 0.6931472, %v3045_v60  ;;  %v1781_v22 = vpop.xlane.xlu1 %1780 }
 0x40a   :  { %3052 = vlog2.f32 %v1781_v22  ;;  %v1779_v48 = vpop.xlane.xlu0 %1778 }
 0x40b   :  { %v2027_v34 = vsub.f32 %v4178_v57, %v1901_v46  ;;  %3054 = vlog2.f32 %v1779_v48 }
 0x40c   :  { %v3047_v20 = vpop.eup %3046 }
 0x40d   :  { %v3049_v29 = vpop.eup %3048  ;;  %2091 = vst [vmem:[#allocation7 + $0x8] sm:$0xff] %v2027_v34  ;;  %v1905_v23 = vmul.f32 0.6931472, %v3047_v20  ;;  %v1785_v18 = vpop.xlane.xlu1 %1784 }
 0x40e   :  { %v1899_v11 = vmul.f32 0.6931472, %v3049_v29  ;;  %3056 = vlog2.f32 %v1785_v18  ;;  %v1783_v38 = vpop.xlane.xlu0 %1782 }
 0x40f   :  { %v2029_v8 = vsub.f32 %v3785_v16, %v1905_v23  ;;  %3058 = vlog2.f32 %v1783_v38 }
 0x410   :  { %v2026_v6 = vsub.f32 %v3788_v4, %v1899_v11  ;;  %v4179_v11 = vld [vmem:[#allocation22_spill] sm:$0xff] }
 0x411   :  { %v3051_v60 = vpop.eup %3050  ;;  %2093 = vst [vmem:[#allocation7 + $0x18] sm:$0xff] %v2029_v8  ;;  %v1789_v22 = vpop.xlane.xlu1 %1788 }
 0x412   :  { %2090 = vst [vmem:[#allocation7] sm:$0xff] %v2026_v6  ;;  %v1903_v49 = vmul.f32 0.6931472, %v3051_v60  ;;  %3060 = vlog2.f32 %v1789_v22  ;;  %v1787_v57 = vpop.xlane.xlu0 %1786 }
 0x413   :  { %3062 = vlog2.f32 %v1787_v57 }
 0x414   :  { %v3053_v46 = vpop.eup %3052  ;;  %v2028_v48 = vsub.f32 %v3793_v44, %v1903_v49 }
 0x415   :  { %v3055_v34 = vpop.eup %3054  ;;  %v1909_v29 = vmul.f32 0.6931472, %v3053_v46  ;;  %v1793_v20 = vpop.xlane.xlu1 %1792 }
 0x416   :  { %2092 = vst [vmem:[#allocation7 + $0x10] sm:$0xff] %v2028_v48  ;;  %v1907_v18 = vmul.f32 0.6931472, %v3055_v34  ;;  %3064 = vlog2.f32 %v1793_v20  ;;  %v1791_v16 = vpop.xlane.xlu0 %1790 }
 0x417   :  { %v2031_v4 = vsub.f32 %v3800_v47, %v1909_v29  ;;  %3066 = vlog2.f32 %v1791_v16 }
 0x418   :  { %v3057_v23 = vpop.eup %3056  ;;  %v2030_v38 = vsub.f32 %v4179_v11, %v1907_v18 }
 0x419   :  { %v3059_v8 = vpop.eup %3058  ;;  %2095 = vst [vmem:[#allocation7 + $0x28] sm:$0xff] %v2031_v4  ;;  %v1913_v6 = vmul.f32 0.6931472, %v3057_v23  ;;  %v1797_v60 = vpop.xlane.xlu1 %1796 }
 0x41a   :  { %2094 = vst [vmem:[#allocation7 + $0x20] sm:$0xff] %v2030_v38  ;;  %v1911_v22 = vmul.f32 0.6931472, %v3059_v8  ;;  %3068 = vlog2.f32 %v1797_v60  ;;  %v1795_v44 = vpop.xlane.xlu0 %1794  ;;  %v4180_v60 = vld [vmem:[#allocation23_spill] sm:$0xff] }
 0x41b   :  { %v2033_v49 = vsub.f32 %v3808_v58, %v1913_v6  ;;  %3070 = vlog2.f32 %v1795_v44 }
 0x41c   :  { %v3061_v57 = vpop.eup %3060  ;;  %v2032_v46 = vsub.f32 %v3804_v41, %v1911_v22 }
 0x41d   :  { %v3063_v48 = vpop.eup %3062  ;;  %2097 = vst [vmem:[#allocation7 + $0x38] sm:$0xff] %v2033_v49  ;;  %v1917_v47 = vmul.f32 0.6931472, %v3061_v57  ;;  %v1801_v34 = vpop.xlane.xlu1 %1800 }
 0x41e   :  { %2096 = vst [vmem:[#allocation7 + $0x30] sm:$0xff] %v2032_v46  ;;  %v1915_v29 = vmul.f32 0.6931472, %v3063_v48  ;;  %3072 = vlog2.f32 %v1801_v34  ;;  %v1799_v20 = vpop.xlane.xlu0 %1798 }
 0x41f   :  { %v2035_v18 = vsub.f32 %v3816_v56, %v1917_v47  ;;  %3074 = vlog2.f32 %v1799_v20 }
 0x420   :  { %v3065_v16 = vpop.eup %3064  ;;  %v2034_v4 = vsub.f32 %v3812_v27, %v1915_v29 }
 0x421   :  { %v3067_v23 = vpop.eup %3066  ;;  %2099 = vst [vmem:[#allocation7 + $0x48] sm:$0xff] %v2035_v18  ;;  %v1921_v58 = vmul.f32 0.6931472, %v3065_v16  ;;  %v1805_v11 = vpop.xlane.xlu1 %1804 }
 0x422   :  { %2098 = vst [vmem:[#allocation7 + $0x40] sm:$0xff] %v2034_v4  ;;  %v1919_v41 = vmul.f32 0.6931472, %v3067_v23  ;;  %3076 = vlog2.f32 %v1805_v11  ;;  %v1803_v38 = vpop.xlane.xlu0 %1802 }
 0x423   :  { %v2037_v8 = vsub.f32 %v3824_v52, %v1921_v58  ;;  %3078 = vlog2.f32 %v1803_v38 }
 0x424   :  { %v3069_v6 = vpop.eup %3068  ;;  %v2036_v22 = vsub.f32 %v4180_v60, %v1919_v41 }
 0x425   :  { %v3071_v44 = vpop.eup %3070  ;;  %2101 = vst [vmem:[#allocation7 + $0x58] sm:$0xff] %v2037_v8  ;;  %v1925_v56 = vmul.f32 0.6931472, %v3069_v6  ;;  %v1809_v49 = vpop.xlane.xlu1 %1808 }
 0x426   :  { %2100 = vst [vmem:[#allocation7 + $0x50] sm:$0xff] %v2036_v22  ;;  %v1923_v27 = vmul.f32 0.6931472, %v3071_v44  ;;  %3080 = vlog2.f32 %v1809_v49  ;;  %v1807_v57 = vpop.xlane.xlu0 %1806 }
 0x427   :  { %v2039_v46 = vsub.f32 %v3832_v42, %v1925_v56  ;;  %3082 = vlog2.f32 %v1807_v57 }
 0x428   :  { %v3073_v48 = vpop.eup %3072  ;;  %v2038_v47 = vsub.f32 %v3828_v2, %v1923_v27 }
 0x429   :  { %v3075_v34 = vpop.eup %3074  ;;  %2103 = vst [vmem:[#allocation7 + $0x68] sm:$0xff] %v2039_v46  ;;  %v1929_v52 = vmul.f32 0.6931472, %v3073_v48  ;;  %v1813_v29 = vpop.xlane.xlu1 %1812 }
 0x42a   :  { %2102 = vst [vmem:[#allocation7 + $0x60] sm:$0xff] %v2038_v47  ;;  %v1927_v20 = vmul.f32 0.6931472, %v3075_v34  ;;  %3084 = vlog2.f32 %v1813_v29  ;;  %v1811_v18 = vpop.xlane.xlu0 %1810 }
 0x42b   :  { %v2041_v16 = vsub.f32 %v3840_v61, %v1929_v52  ;;  %3086 = vlog2.f32 %v1811_v18 }
 0x42c   :  { %v3077_v4 = vpop.eup %3076  ;;  %v2040_v23 = vsub.f32 %v3836_v7, %v1927_v20 }
 0x42d   :  { %v3079_v58 = vpop.eup %3078  ;;  %2105 = vst [vmem:[#allocation7 + $0x78] sm:$0xff] %v2041_v16  ;;  %v1933_v42 = vmul.f32 0.6931472, %v3077_v4  ;;  %v1817_v11 = vpop.xlane.xlu1 %1816 }
 0x42e   :  { %2104 = vst [vmem:[#allocation7 + $0x70] sm:$0xff] %v2040_v23  ;;  %v1931_v2 = vmul.f32 0.6931472, %v3079_v58  ;;  %3088 = vlog2.f32 %v1817_v11  ;;  %v1815_v41 = vpop.xlane.xlu0 %1814 }
 0x42f   :  { %v2043_v38 = vsub.f32 %v3848_v21, %v1933_v42  ;;  %3090 = vlog2.f32 %v1815_v41 }
 0x430   :  { %v3081_v8 = vpop.eup %3080  ;;  %v2042_v6 = vsub.f32 %v3844_v14, %v1931_v2 }
 0x431   :  { %v3083_v60 = vpop.eup %3082  ;;  %2107 = vst [vmem:[#allocation7 + $0x88] sm:$0xff] %v2043_v38  ;;  %v1937_v61 = vmul.f32 0.6931472, %v3081_v8  ;;  %v1821_v22 = vpop.xlane.xlu1 %1820 }
 0x432   :  { %2106 = vst [vmem:[#allocation7 + $0x80] sm:$0xff] %v2042_v6  ;;  %v1935_v7 = vmul.f32 0.6931472, %v3083_v60  ;;  %3092 = vlog2.f32 %v1821_v22  ;;  %v1819_v44 = vpop.xlane.xlu0 %1818 }
 0x433   :  { %v2045_v56 = vsub.f32 %v3856_v26, %v1937_v61  ;;  %3094 = vlog2.f32 %v1819_v44 }
 0x434   :  { %v3085_v49 = vpop.eup %3084  ;;  %v2044_v27 = vsub.f32 %v3852_v15, %v1935_v7 }
 0x435   :  { %v3087_v57 = vpop.eup %3086  ;;  %2109 = vst [vmem:[#allocation7 + $0x98] sm:$0xff] %v2045_v56  ;;  %v1941_v21 = vmul.f32 0.6931472, %v3085_v49  ;;  %v1825_v46 = vpop.xlane.xlu1 %1824 }
 0x436   :  { %2108 = vst [vmem:[#allocation7 + $0x90] sm:$0xff] %v2044_v27  ;;  %v1939_v14 = vmul.f32 0.6931472, %v3087_v57  ;;  %3096 = vlog2.f32 %v1825_v46  ;;  %v1823_v48 = vpop.xlane.xlu0 %1822 }
 0x437   :  { %v2047_v47 = vsub.f32 %v3864_v33, %v1941_v21  ;;  %3098 = vlog2.f32 %v1823_v48 }
 0x438   :  { %v3089_v34 = vpop.eup %3088  ;;  %v2046_v52 = vsub.f32 %v3860_v40, %v1939_v14 }
 0x439   :  { %v3091_v29 = vpop.eup %3090  ;;  %2111 = vst [vmem:[#allocation7 + $0xa8] sm:$0xff] %v2047_v47  ;;  %v1945_v26 = vmul.f32 0.6931472, %v3089_v34  ;;  %v1829_v20 = vpop.xlane.xlu1 %1828 }
 0x43a   :  { %2110 = vst [vmem:[#allocation7 + $0xa0] sm:$0xff] %v2046_v52  ;;  %v1943_v15 = vmul.f32 0.6931472, %v3091_v29  ;;  %3100 = vlog2.f32 %v1829_v20  ;;  %v1827_v18 = vpop.xlane.xlu0 %1826 }
 0x43b   :  { %v2049_v16 = vsub.f32 %v3872_v3, %v1945_v26  ;;  %3102 = vlog2.f32 %v1827_v18 }
 0x43c   :  { %v3093_v4 = vpop.eup %3092  ;;  %v2048_v23 = vsub.f32 %v3868_v32, %v1943_v15 }
 0x43d   :  { %v3095_v58 = vpop.eup %3094  ;;  %2113 = vst [vmem:[#allocation7 + $0xb8] sm:$0xff] %v2049_v16  ;;  %v1949_v33 = vmul.f32 0.6931472, %v3093_v4  ;;  %v1833_v42 = vpop.xlane.xlu1 %1832 }
 0x43e   :  { %2112 = vst [vmem:[#allocation7 + $0xb0] sm:$0xff] %v2048_v23  ;;  %v1947_v40 = vmul.f32 0.6931472, %v3095_v58  ;;  %3104 = vlog2.f32 %v1833_v42  ;;  %v1831_v11 = vpop.xlane.xlu0 %1830 }
 0x43f   :  { %v2051_v2 = vsub.f32 %v3880_v30, %v1949_v33  ;;  %3106 = vlog2.f32 %v1831_v11 }
 0x440   :  { %v3097_v41 = vpop.eup %3096  ;;  %v2050_v38 = vsub.f32 %v3876_v5, %v1947_v40 }
 0x441   :  { %v3099_v8 = vpop.eup %3098  ;;  %2115 = vst [vmem:[#allocation7 + $0xc8] sm:$0xff] %v2051_v2  ;;  %v1953_v3 = vmul.f32 0.6931472, %v3097_v41  ;;  %v1837_v6 = vpop.xlane.xlu1 %1836 }
 0x442   :  { %2114 = vst [vmem:[#allocation7 + $0xc0] sm:$0xff] %v2050_v38  ;;  %v1951_v32 = vmul.f32 0.6931472, %v3099_v8  ;;  %3108 = vlog2.f32 %v1837_v6  ;;  %v1835_v60 = vpop.xlane.xlu0 %1834 }
 0x443   :  { %v2053_v61 = vsub.f32 %v3888_v59, %v1953_v3  ;;  %3110 = vlog2.f32 %v1835_v60 }
 0x444   :  { %v3101_v22 = vpop.eup %3100  ;;  %v2052_v7 = vsub.f32 %v3884_v1, %v1951_v32 }
 0x445   :  { %v3103_v44 = vpop.eup %3102  ;;  %2117 = vst [vmem:[#allocation7 + $0xd8] sm:$0xff] %v2053_v61  ;;  %v1957_v30 = vmul.f32 0.6931472, %v3101_v22  ;;  %v1841_v56 = vpop.xlane.xlu1 %1840 }
 0x446   :  { %2116 = vst [vmem:[#allocation7 + $0xd0] sm:$0xff] %v2052_v7  ;;  %v1955_v5 = vmul.f32 0.6931472, %v3103_v44  ;;  %3112 = vlog2.f32 %v1841_v56  ;;  %v1839_v49 = vpop.xlane.xlu0 %1838 }
 0x447   :  { %v2055_v27 = vsub.f32 %v3896_v25, %v1957_v30  ;;  %3114 = vlog2.f32 %v1839_v49 }
 0x448   :  { %v3105_v57 = vpop.eup %3104  ;;  %v2054_v21 = vsub.f32 %v3892_v19, %v1955_v5 }
 0x449   :  { %v3107_v46 = vpop.eup %3106  ;;  %2119 = vst [vmem:[#allocation7 + $0xe8] sm:$0xff] %v2055_v27  ;;  %v1961_v59 = vmul.f32 0.6931472, %v3105_v57  ;;  %v1845_v14 = vpop.xlane.xlu1 %1844 }
 0x44a   :  { %2118 = vst [vmem:[#allocation7 + $0xe0] sm:$0xff] %v2054_v21  ;;  %v1959_v1 = vmul.f32 0.6931472, %v3107_v46  ;;  %3116 = vlog2.f32 %v1845_v14  ;;  %v1843_v48 = vpop.xlane.xlu0 %1842 }
 0x44b   :  { %v2057_v47 = vsub.f32 %v3904_v50, %v1961_v59  ;;  %3118 = vlog2.f32 %v1843_v48 }
 0x44c   :  { %v3109_v34 = vpop.eup %3108  ;;  %v2056_v52 = vsub.f32 %v3900_v24, %v1959_v1 }
 0x44d   :  { %v3111_v29 = vpop.eup %3110  ;;  %2121 = vst [vmem:[#allocation7 + $0xf8] sm:$0xff] %v2057_v47  ;;  %v1965_v25 = vmul.f32 0.6931472, %v3109_v34  ;;  %v1849_v26 = vpop.xlane.xlu1 %1848 }
 0x44e   :  { %2120 = vst [vmem:[#allocation7 + $0xf0] sm:$0xff] %v2056_v52  ;;  %v1963_v19 = vmul.f32 0.6931472, %v3111_v29  ;;  %3120 = vlog2.f32 %v1849_v26  ;;  %v1847_v20 = vpop.xlane.xlu0 %1846 }
 0x44f   :  { %v2059_v15 = vsub.f32 %v3912_v13, %v1965_v25  ;;  %3122 = vlog2.f32 %v1847_v20 }
 0x450   :  { %v3113_v18 = vpop.eup %3112  ;;  %v2058_v16 = vsub.f32 %v3908_v31, %v1963_v19 }
 0x451   :  { %v3115_v4 = vpop.eup %3114  ;;  %2123 = vst [vmem:[#allocation7 + $0x108] sm:$0xff] %v2059_v15  ;;  %v1969_v50 = vmul.f32 0.6931472, %v3113_v18  ;;  %v1853_v23 = vpop.xlane.xlu1 %1852 }
 0x452   :  { %2122 = vst [vmem:[#allocation7 + $0x100] sm:$0xff] %v2058_v16  ;;  %v1967_v24 = vmul.f32 0.6931472, %v3115_v4  ;;  %3124 = vlog2.f32 %v1853_v23  ;;  %v1851_v58 = vpop.xlane.xlu0 %1850 }
 0x453   :  { %v2061_v33 = vsub.f32 %v3920_v39, %v1969_v50  ;;  %3126 = vlog2.f32 %v1851_v58 }
 0x454   :  { %v3117_v42 = vpop.eup %3116  ;;  %v2060_v40 = vsub.f32 %v3916_v53, %v1967_v24 }
 0x455   :  { %v3119_v11 = vpop.eup %3118  ;;  %2125 = vst [vmem:[#allocation7 + $0x118] sm:$0xff] %v2061_v33  ;;  %v1973_v13 = vmul.f32 0.6931472, %v3117_v42  ;;  %v1857_v2 = vpop.xlane.xlu1 %1856 }
 0x456   :  { %2124 = vst [vmem:[#allocation7 + $0x110] sm:$0xff] %v2060_v40  ;;  %v1971_v31 = vmul.f32 0.6931472, %v3119_v11  ;;  %3128 = vlog2.f32 %v1857_v2  ;;  %v1855_v41 = vpop.xlane.xlu0 %1854 }
 0x457   :  { %v2063_v38 = vsub.f32 %v3928_v51, %v1973_v13  ;;  %3130 = vlog2.f32 %v1855_v41  ;;  %v4181_v13 = vld [vmem:[#allocation25_spill] sm:$0xff]  ;;  %v4182_v41 = vld [vmem:[#allocation24_spill] sm:$0xff] }
 0x458   :  { %v3121_v8 = vpop.eup %3120  ;;  %v2062_v3 = vsub.f32 %v3924_v17, %v1971_v31 }
 0x459   :  { %v3123_v6 = vpop.eup %3122  ;;  %2127 = vst [vmem:[#allocation7 + $0x128] sm:$0xff] %v2063_v38  ;;  %v1977_v39 = vmul.f32 0.6931472, %v3121_v8  ;;  %v1861_v32 = vpop.xlane.xlu1 %1860 }
 0x45a   :  { %2126 = vst [vmem:[#allocation7 + $0x120] sm:$0xff] %v2062_v3  ;;  %v1975_v53 = vmul.f32 0.6931472, %v3123_v6  ;;  %3132 = vlog2.f32 %v1861_v32  ;;  %v1859_v60 = vpop.xlane.xlu0 %1858 }
 0x45b   :  { %v2065_v61 = vsub.f32 %v3936_v62, %v1977_v39  ;;  %3134 = vlog2.f32 %v1859_v60  ;;  %v4183_v39 = vld [vmem:[#allocation11_spill] sm:$0xff]  ;;  %v4184_v60 = vld [vmem:[#allocation26_spill] sm:$0xff] }
 0x45c   :  { %v3125_v22 = vpop.eup %3124  ;;  %v2064_v7 = vsub.f32 %v3932_v43, %v1975_v53 }
 0x45d   :  { %v3127_v44 = vpop.eup %3126  ;;  %2129 = vst [vmem:[#allocation7 + $0x138] sm:$0xff] %v2065_v61  ;;  %v1981_v51 = vmul.f32 0.6931472, %v3125_v22  ;;  %v1865_v30 = vpop.xlane.xlu1 %1864 }
 0x45e   :  { %2128 = vst [vmem:[#allocation7 + $0x130] sm:$0xff] %v2064_v7  ;;  %v1979_v17 = vmul.f32 0.6931472, %v3127_v44  ;;  %3136 = vlog2.f32 %v1865_v30  ;;  %v1863_v56 = vpop.xlane.xlu0 %1862 }
 0x45f   :  { %v2067_v5 = vsub.f32 %v3944_v12, %v1981_v51  ;;  %3138 = vlog2.f32 %v1863_v56 }
 0x460   :  { %v3129_v49 = vpop.eup %3128  ;;  %v2066_v27 = vsub.f32 %v3940_v10, %v1979_v17  ;;  %v4185_v17 = vld [vmem:[#allocation13_spill] sm:$0xff] }
 0x461   :  { %v3131_v57 = vpop.eup %3130  ;;  %2131 = vst [vmem:[#allocation7 + $0x148] sm:$0xff] %v2067_v5  ;;  %v1985_v62 = vmul.f32 0.6931472, %v3129_v49  ;;  %v1869_v21 = vpop.xlane.xlu1 %1868  ;;  %v4186_v49 = vld [vmem:[#allocation12_spill] sm:$0xff] }
 0x462   :  { %2130 = vst [vmem:[#allocation7 + $0x140] sm:$0xff] %v2066_v27  ;;  %v1983_v43 = vmul.f32 0.6931472, %v3131_v57  ;;  %3140 = vlog2.f32 %v1869_v21  ;;  %v1867_v46 = vpop.xlane.xlu0 %1866 }
 0x463   :  { %v2069_v59 = vsub.f32 %v3952_v54, %v1985_v62  ;;  %3142 = vlog2.f32 %v1867_v46 }
 0x464   :  { %v3133_v14 = vpop.eup %3132  ;;  %v2068_v1 = vsub.f32 %v3948_v37, %v1983_v43 }
 0x465   :  { %v3135_v48 = vpop.eup %3134  ;;  %2133 = vst [vmem:[#allocation7 + $0x158] sm:$0xff] %v2069_v59  ;;  %v1989_v12 = vmul.f32 0.6931472, %v3133_v14  ;;  %v1873_v47 = vpop.xlane.xlu1 %1872  ;;  %v4187_v59 = vld [vmem:[#allocation15_spill] sm:$0xff] }
 0x466   :  { %2132 = vst [vmem:[#allocation7 + $0x150] sm:$0xff] %v2068_v1  ;;  %v1987_v10 = vmul.f32 0.6931472, %v3135_v48  ;;  %3144 = vlog2.f32 %v1873_v47  ;;  %v1871_v34 = vpop.xlane.xlu0 %1870  ;;  %v4188_v48 = vld [vmem:[#allocation14_spill] sm:$0xff] }
 0x467   :  { %v2071_v52 = vsub.f32 %v3960_v9, %v1989_v12  ;;  %3146 = vlog2.f32 %v1871_v34 }
 0x468   :  { %v3137_v29 = vpop.eup %3136  ;;  %v2070_v25 = vsub.f32 %v3956_v63, %v1987_v10 }
 0x469   :  { %v3139_v26 = vpop.eup %3138  ;;  %2135 = vst [vmem:[#allocation7 + $0x168] sm:$0xff] %v2071_v52  ;;  %v1993_v54 = vmul.f32 0.6931472, %v3137_v29  ;;  %v1877_v19 = vpop.xlane.xlu1 %1876 }
 0x46a   :  { %2134 = vst [vmem:[#allocation7 + $0x160] sm:$0xff] %v2070_v25  ;;  %v1991_v37 = vmul.f32 0.6931472, %v3139_v26  ;;  %3148 = vlog2.f32 %v1877_v19  ;;  %v1875_v20 = vpop.xlane.xlu0 %1874  ;;  %v4189_v25 = vld [vmem:[#allocation16_spill] sm:$0xff] }
 0x46b   :  { %v2073_v15 = vsub.f32 %v3968_v0, %v1993_v54  ;;  %3150 = vlog2.f32 %v1875_v20 }
 0x46c   :  { %v3141_v18 = vpop.eup %3140  ;;  %v2072_v16 = vsub.f32 %v3964_v36, %v1991_v37 }
 0x46d   :  { %v3143_v4 = vpop.eup %3142  ;;  %2137 = vst [vmem:[#allocation7 + $0x178] sm:$0xff] %v2073_v15  ;;  %v1997_v9 = vmul.f32 0.6931472, %v3141_v18  ;;  %v1881_v50 = vpop.xlane.xlu1 %1880  ;;  %v4190_v18 = vld [vmem:[#allocation17_spill] sm:$0xff] }
 0x46e   :  { %2136 = vst [vmem:[#allocation7 + $0x170] sm:$0xff] %v2072_v16  ;;  %v1995_v63 = vmul.f32 0.6931472, %v3143_v4  ;;  %3152 = vlog2.f32 %v1881_v50  ;;  %v1879_v23 = vpop.xlane.xlu0 %1878  ;;  %v4191_v50 = vld [vmem:[#allocation19_spill] sm:$0xff] }
 0x46f   :  { %v2075_v24 = vsub.f32 %v3976_v55, %v1997_v9  ;;  %3154 = vlog2.f32 %v1879_v23  ;;  %v4192_v23 = vld [vmem:[#allocation18_spill] sm:$0xff] }
 0x470   :  { %v3145_v58 = vpop.eup %3144  ;;  %v2074_v33 = vsub.f32 %v3972_v45, %v1995_v63 }
 0x471   :  { %v3147_v42 = vpop.eup %3146  ;;  %2139 = vst [vmem:[#allocation7 + $0x188] sm:$0xff] %v2075_v24  ;;  %v2001_v0 = vmul.f32 0.6931472, %v3145_v58  ;;  %v1885_v40 = vpop.xlane.xlu1 %1884 }
 0x472   :  { %2138 = vst [vmem:[#allocation7 + $0x180] sm:$0xff] %v2074_v33  ;;  %v1999_v36 = vmul.f32 0.6931472, %v3147_v42  ;;  %3156 = vlog2.f32 %v1885_v40  ;;  %v1883_v11 = vpop.xlane.xlu0 %1882 }
 0x473   :  { %v2077_v2 = vsub.f32 %v4181_v13, %v2001_v0  ;;  %3158 = vlog2.f32 %v1883_v11 }
 0x474   :  { %v3149_v31 = vpop.eup %3148  ;;  %v2076_v38 = vsub.f32 %v4182_v41, %v1999_v36 }
 0x475   :  { %v3151_v8 = vpop.eup %3150  ;;  %2141 = vst [vmem:[#allocation7 + $0x198] sm:$0xff] %v2077_v2  ;;  %v2005_v55 = vmul.f32 0.6931472, %v3149_v31  ;;  %v1889_v3 = vpop.xlane.xlu1 %1888 }
 0x476   :  { %2140 = vst [vmem:[#allocation7 + $0x190] sm:$0xff] %v2076_v38  ;;  %v2003_v45 = vmul.f32 0.6931472, %v3151_v8  ;;  %3160 = vlog2.f32 %v1889_v3  ;;  %v1887_v6 = vpop.xlane.xlu0 %1886 }
 0x477   :  { %v2079_v32 = vsub.f32 %v4183_v39, %v2005_v55  ;;  %3162 = vlog2.f32 %v1887_v6 }
 0x478   :  { %v3153_v53 = vpop.eup %3152  ;;  %v2078_v61 = vsub.f32 %v4184_v60, %v2003_v45 }
 0x479   :  { %v3155_v22 = vpop.eup %3154  ;;  %2143 = vst [vmem:[#allocation7 + $0x1a8] sm:$0xff] %v2079_v32  ;;  %v2009_v7 = vmul.f32 0.6931472, %v3153_v53  ;;  %v1893_v44 = vpop.xlane.xlu1 %1892 }
 0x47a   :  { %2142 = vst [vmem:[#allocation7 + $0x1a0] sm:$0xff] %v2078_v61  ;;  %v2007_v51 = vmul.f32 0.6931472, %v3155_v22  ;;  %3164 = vlog2.f32 %v1893_v44  ;;  %v1891_v30 = vpop.xlane.xlu0 %1890 }
 0x47b   :  { %v2081_v56 = vsub.f32 %v4185_v17, %v2009_v7  ;;  %3166 = vlog2.f32 %v1891_v30 }
 0x47c   :  { %v3157_v5 = vpop.eup %3156  ;;  %v2080_v27 = vsub.f32 %v4186_v49, %v2007_v51 }
 0x47d   :  { %v3159_v57 = vpop.eup %3158  ;;  %2145 = vst [vmem:[#allocation7 + $0x1b8] sm:$0xff] %v2081_v56  ;;  %v2013_v62 = vmul.f32 0.6931472, %v3157_v5  ;;  %v1897_v21 = vpop.xlane.xlu1 %1896 }
 0x47e   :  { %2144 = vst [vmem:[#allocation7 + $0x1b0] sm:$0xff] %v2080_v27  ;;  %v2011_v43 = vmul.f32 0.6931472, %v3159_v57  ;;  %3168 = vlog2.f32 %v1897_v21  ;;  %v1895_v46 = vpop.xlane.xlu0 %1894 }
 0x47f   :  { %v2083_v14 = vsub.f32 %v4187_v59, %v2013_v62  ;;  %3170 = vlog2.f32 %v1895_v46 }
 0x480   :  { %v3161_v1 = vpop.eup %3160  ;;  %v2082_v12 = vsub.f32 %v4188_v48, %v2011_v43 }
 0x481   :  { %v3163_v47 = vpop.eup %3162  ;;  %2147 = vst [vmem:[#allocation7 + $0x1c8] sm:$0xff] %v2083_v14  ;;  %v2017_v10 = vmul.f32 0.6931472, %v3161_v1 }
 0x482   :  { %2146 = vst [vmem:[#allocation7 + $0x1c0] sm:$0xff] %v2082_v12  ;;  %v2015_v34 = vmul.f32 0.6931472, %v3163_v47 }
 0x483   :  { %v2085_v52 = vsub.f32 %v4016_v35, %v2017_v10 }
 0x484   :  { %v3165_v29 = vpop.eup %3164  ;;  %v2084_v26 = vsub.f32 %v4189_v25, %v2015_v34 }
 0x485   :  { %v3167_v54 = vpop.eup %3166  ;;  %2149 = vst [vmem:[#allocation7 + $0x1d8] sm:$0xff] %v2085_v52  ;;  %v2021_v19 = vmul.f32 0.6931472, %v3165_v29 }
 0x486   :  { %2148 = vst [vmem:[#allocation7 + $0x1d0] sm:$0xff] %v2084_v26  ;;  %v2019_v37 = vmul.f32 0.6931472, %v3167_v54 }
 0x487   :  { %v2087_v20 = vsub.f32 %v4024_v28, %v2021_v19 }
 0x488   :  { %v3169_v15 = vpop.eup %3168  ;;  %v2086_v16 = vsub.f32 %v4190_v18, %v2019_v37 }
 0x489   :  { %v3171_v4 = vpop.eup %3170  ;;  %2151 = vst [vmem:[#allocation7 + $0x1e8] sm:$0xff] %v2087_v20  ;;  %v2025_v9 = vmul.f32 0.6931472, %v3169_v15 }
 0x48a   :  { %2150 = vst [vmem:[#allocation7 + $0x1e0] sm:$0xff] %v2086_v16  ;;  %v2023_v35 = vmul.f32 0.6931472, %v3171_v4 }
 0x48b   :  { %v2089_v63 = vsub.f32 %v4191_v50, %v2025_v9 }
 0x48c   :  { %v2088_v24 = vsub.f32 %v4192_v23, %v2023_v35 }
 0x48d   :  { %2153 = vst [vmem:[#allocation7 + $0x1f8] sm:$0xff] %v2089_v63 }
 0x48e   :  { %2152 = vst [vmem:[#allocation7 + $0x1f0] sm:$0xff] %v2088_v24 }
 0x48f   :  { %3227 = shalt.err (!%p3224_p6)
}
 0x490   :  { %s3228_s10 = scalar_lea.hbm %s4117_s2, 8192 }
 0x491   :  { %p3229_p7 = scmp.ne.s32.totalorder %s4117_s2, %s3228_s10  ;;  %p3232_p8 = scmp.lt.u32.totalorder %s3228_s10, %s4117_s2 }
 0x493   :  { %p3234_p9 = pnand %p3232_p8, %p3229_p7 }
 0x495   :  { %3237 = shalt.err (!%p3234_p9)
}
 0x496   :  { %2165 = dma.vmem_to_hbm [thread:$0]  %s2160_s6, 8192, %s4117_s2, [#allocation4], %s3245_s19, %s3245_s19, %s3246_s20  }
 0x497   :  { %3242 = dma.done.wait [#allocation4], 8192  }
 0x498   :  { %3243 = vsyncadd [#allocation4], 4294959104 }
 0x499   :  { %2169 = vsyncpa [#allocation3], 1 }
 0x49a   :  { %2170 = vsyncpa [#allocation6], 1 }
 0x49b   :  { %2171 = vsyncpa [#allocation4], 1 }

</bundles_post_ra>
